<compile_context>
chip_gen: v7x
topology: tpu7x:2x2x1
jax: 0.10.0
libtpu: 0.0.40
codegen_flags: <defaults>
</compile_context>

<pallas_src>
import math

import numpy as np
import jax
import jax.numpy as jnp
from jax import lax
from jax.experimental import pallas as pl
from jax.experimental.pallas import tpu as pltpu

# ---- small, module-consistent sizes -----------------------------------------
B, N, H = 2, 8, 32          # batch, n_sents, hidden_size
HEADS = 4                   # heads (H % HEADS == 0)
D_FF = 64                   # feed-forward hidden
NUM_LAYERS = 2              # num_inter_layers
DPH = H // HEADS
BN = B * N
EPS = 1e-6

_PARAM_ORDER = ("g1", "be1", "wqkv", "bqkv", "wo", "bo",
                "g2", "be2", "w1", "b1", "w2", "b2")


# ---- in-kernel helpers (f32 VPU/EUP math) ------------------------------------
def _layernorm(x, g, b):
    mu = jnp.mean(x, axis=-1, keepdims=True)
    var = jnp.mean((x - mu) ** 2, axis=-1, keepdims=True)
    return (x - mu) * jax.lax.rsqrt(var + EPS) * g + b


def _gelu(x):
    # matches PositionwiseFeedForward.gelu (tanh approximation)
    return 0.5 * x * (1.0 + jnp.tanh(math.sqrt(2.0 / math.pi) * (x + 0.044715 * x ** 3)))


# ---- fused Pallas kernel: glue + all layers + final head ---------------------
def _fused_encoder_kernel(x_ref, maskcol_ref, maskrow_ref, bias_ref, pe_ref,
                          g1_ref, be1_ref, wqkv_ref, bqkv_ref, wo_ref, bo_ref,
                          g2_ref, be2_ref, w1_ref, b1_ref, w2_ref, b2_ref,
                          gf_ref, bef_ref, wof_ref, bwof_ref,
                          out_ref):
    f32, bf16 = jnp.float32, jnp.bfloat16

    # glue: x = top_vecs * mask + pos_emb  on the batch-flattened (B*N, H) slab
    x = x_ref[...] * maskcol_ref[...] + pe_ref[...]          # f32
    bias = bias_ref[...]                    # (B*N, B*N) additive key mask (0 / -1e18)
    scale = 1.0 / math.sqrt(DPH)
    nt_dims = (((1,), (1,)), ((), ()))      # contract dim 1 of both operands: A @ B^T

    for l in range(NUM_LAYERS):             # static unroll
        xn = _layernorm(x, g1_ref[l], be1_ref[l]) if l != 0 else x

        # fused QKV projection: one (BN,H)x(H,3H) bf16 MXU matmul, f32 accumulation
        qkv = jnp.dot(xn.astype(bf16), wqkv_ref[l],
                      preferred_element_type=f32) + bqkv_ref[l]     # (BN, 3H) f32
        q = (qkv[:, 0 * H:1 * H] * scale).astype(bf16)
        k = qkv[:, 1 * H:2 * H].astype(bf16)
        v = qkv[:, 2 * H:3 * H].astype(bf16)

        # attention: batch separation handled by the block-diagonal bias; per-head
        # context multiplied by the matching Wo row-slice and summed in registers
        # (no scratch, no masked 8-lane stores, no explicit K transpose).
        wo_l = wo_ref[l]                                            # (H, H) bf16
        attn = None
        for h in range(HEADS):                                      # static unroll
            sl = slice(h * DPH, (h + 1) * DPH)
            s = lax.dot_general(q[:, sl], k[:, sl], dimension_numbers=nt_dims,
                                preferred_element_type=f32) + bias  # (BN, BN) f32
            m = jnp.max(s, axis=-1, keepdims=True)
            e = jnp.exp(s - m)
            denom = jnp.sum(e, axis=-1, keepdims=True)
            r = pl.reciprocal(denom, approx=True)
            r = r * (2.0 - denom * r)        # one Newton step -> f32 accuracy
            p = (e * r).astype(bf16)
            ctx_h = jnp.dot(p, v[:, sl], preferred_element_type=f32)   # (BN, DPH)
            part = jnp.dot(ctx_h.astype(bf16), wo_l[sl, :],
                           preferred_element_type=f32)                 # (BN, H)
            attn = part if attn is None else attn + part
        out1 = attn + bo_ref[l] + x          # dropout == identity

        # PositionwiseFeedForward with residual
        xn2 = _layernorm(out1, g2_ref[l], be2_ref[l])
        inter = _gelu(jnp.dot(xn2.astype(bf16), w1_ref[l],
                              preferred_element_type=f32) + b1_ref[l])
        x = jnp.dot(inter.astype(bf16), w2_ref[l],
                    preferred_element_type=f32) + b2_ref[l] + out1

    # final LayerNorm -> Linear(H, 1) -> sigmoid -> mask, emitted lane-dense (1, B*N);
    # dot_general contracts on H so the activation slab is never transposed.
    xn = _layernorm(x, gf_ref[...], bef_ref[...])
    logits = lax.dot_general(wof_ref[...], xn.astype(bf16), dimension_numbers=nt_dims,
                             preferred_element_type=f32) + bwof_ref[...]
    out_ref[...] = jax.nn.sigmoid(logits) * maskrow_ref[...]


# ---- wrapper -----------------------------------------------------------------
def _cost_estimate(operands):
    per_layer = (2 * BN * H * 3 * H                      # fused QKV
                 + HEADS * (2 * 2 * BN * BN * DPH        # scores + context
                            + 2 * BN * DPH * H)          # per-head Wo slice
                 + 2 * BN * H * D_FF                     # W1
                 + 2 * BN * D_FF * H)                    # W2
    flops = NUM_LAYERS * per_layer + 2 * BN * H
    transcendentals = NUM_LAYERS * (HEADS * BN * BN + BN * D_FF) + BN
    bytes_accessed = sum(int(np.prod(o.shape)) * o.dtype.itemsize for o in operands) + BN * 4
    return pl.CostEstimate(flops=flops, transcendentals=transcendentals,
                           bytes_accessed=bytes_accessed)


@jax.jit
def ext_transformer_encoder(top_vecs, mask_bool, layer_params, final_params):
    mask_f = mask_bool.astype(jnp.float32)                  # (B, N), 1.0 = valid
    mask_col = mask_f.reshape(BN, 1)
    mask_row = mask_f.reshape(1, BN)
    # block-diagonal additive key mask: 0 for same-batch valid keys, -1e18 otherwise
    ids = jnp.arange(BN, dtype=jnp.int32) // N
    same_batch = ids[:, None] == ids[None, :]
    attn_bias = jnp.where(same_batch & (mask_row > 0.5), 0.0, -1e18).astype(jnp.float32)
    pe_flat = jnp.tile(positional_encoding(N, H)[0], (B, 1))   # (B*N, H) constant

    bf = lambda w: w.astype(jnp.bfloat16)                   # MXU operands in bf16
    operands = [
        top_vecs.reshape(BN, H), mask_col, mask_row, attn_bias, pe_flat,
        layer_params["g1"], layer_params["be1"],
        bf(layer_params["wqkv"]), layer_params["bqkv"],
        bf(layer_params["wo"]), layer_params["bo"],
        layer_params["g2"], layer_params["be2"],
        bf(layer_params["w1"]), layer_params["b1"],
        bf(layer_params["w2"]), layer_params["b2"],
        final_params["g"], final_params["be"],
        bf(final_params["wo_row"]), final_params["bwo"],
    ]

    scores = pl.pallas_call(
        _fused_encoder_kernel,
        out_shape=jax.ShapeDtypeStruct((1, BN), jnp.float32),
        in_specs=[pl.BlockSpec(memory_space=pltpu.MemorySpace.VMEM) for _ in operands],
        out_specs=pl.BlockSpec(memory_space=pltpu.MemorySpace.VMEM),
        cost_estimate=_cost_estimate(operands),
    )(*operands)
    return scores.reshape(B, N)


# ---- parameter init (deterministic, PyTorch nn.Linear-style uniform) ---------
def _linear(key, fin, fout):
    k1, k2 = jax.random.split(key)
    bound = 1.0 / math.sqrt(fin)
    w = jax.random.uniform(k1, (fin, fout), jnp.float32, -bound, bound)
    b = jax.random.uniform(k2, (1, fout), jnp.float32, -bound, bound)
    return w, b


def init_params(key):
    keys = jax.random.split(key, NUM_LAYERS + 1)
    per_layer = []
    for i in range(NUM_LAYERS):
        ks = jax.random.split(keys[i], 6)
        wq, bq = _linear(ks[0], H, H)
        wk, bk = _linear(ks[1], H, H)
        wv, bv = _linear(ks[2], H, H)
        wo, bo = _linear(ks[3], H, H)
        w1, b1 = _linear(ks[4], H, D_FF)
        w2, b2 = _linear(ks[5], D_FF, H)
        per_layer.append(dict(
            g1=jnp.ones((1, H), jnp.float32), be1=jnp.zeros((1, H), jnp.float32),
            wqkv=jnp.concatenate([wq, wk, wv], axis=1),      # (H, 3H) packed QKV
            bqkv=jnp.concatenate([bq, bk, bv], axis=1),      # (1, 3H)
            wo=wo, bo=bo,
            g2=jnp.ones((1, H), jnp.float32), be2=jnp.zeros((1, H), jnp.float32),
            w1=w1, b1=b1, w2=w2, b2=b2))
    stacked = {name: jnp.stack([lp[name] for lp in per_layer], axis=0)
               for name in _PARAM_ORDER}
    wof, bwof = _linear(keys[-1], H, 1)
    final = dict(g=jnp.ones((1, H), jnp.float32), be=jnp.zeros((1, H), jnp.float32),
                 wo_row=wof.T, bwo=bwof)                     # (1, H), (1, 1)
    return stacked, final


# ---- PositionalEncoding.pe buffer -------------------------------------------
def positional_encoding(n, dim):
    position = np.arange(n, dtype=np.float32)[:, None]
    div_term = np.exp(np.arange(0, dim, 2, dtype=np.float32) * -(math.log(10000.0) / dim))
    pe = np.zeros((n, dim), np.float32)
    pe[:, 0::2] = np.sin(position * div_term)
    pe[:, 1::2] = np.cos(position * div_term)
    return jnp.asarray(pe)[None]                             # (1, n, dim)


# ---- plain-JAX f32 reference (for correctness check) --------------------------
def reference(top_vecs, mask_bool, layer_params, final_params):
    mask_f = mask_bool.astype(jnp.float32)
    pe = positional_encoding(N, H)
    x = top_vecs * mask_f[:, :, None] + pe
    pad = (1.0 - mask_f)[:, None, None, :]                   # (B,1,1,N)
    for i in range(NUM_LAYERS):
        p = {name: layer_params[name][i] for name in _PARAM_ORDER}
        xn = _layernorm(x, p["g1"], p["be1"]) if i != 0 else x
        qkv = xn @ p["wqkv"] + p["bqkv"]
        q, k, v = qkv[..., :H], qkv[..., H:2 * H], qkv[..., 2 * H:]

        def shp(t):
            return t.reshape(B, N, HEADS, DPH).transpose(0, 2, 1, 3)
        qh, kh, vh = shp(q), shp(k), shp(v)
        s = (qh / math.sqrt(DPH)) @ kh.transpose(0, 1, 3, 2)
        s = jnp.where(pad > 0.5, -1e18, s)
        a = jax.nn.softmax(s, axis=-1)
        ctx = (a @ vh).transpose(0, 2, 1, 3).reshape(B, N, H)
        out1 = ctx @ p["wo"] + p["bo"] + x
        xn2 = _layernorm(out1, p["g2"], p["be2"])
        x = _gelu(xn2 @ p["w1"] + p["b1"]) @ p["w2"] + p["b2"] + out1
    xn = _layernorm(x, final_params["g"], final_params["be"])
    return jax.nn.sigmoid(xn @ final_params["wo_row"].T + final_params["bwo"])[..., 0] * mask_f


if __name__ == "__main__":
    key = jax.random.PRNGKey(0)
    kp, kx = jax.random.split(key)
    layer_params, final_params = init_params(kp)

    top_vecs = jax.random.normal(kx, (B, N, H), jnp.float32)
    lengths = jnp.array([N, 5])
    mask_bool = jnp.arange(N)[None, :] < lengths[:, None]    # (B, N), True = valid

    out = ext_transformer_encoder(top_vecs, mask_bool, layer_params, final_params)
    out = jax.block_until_ready(out)

    ref = reference(top_vecs, mask_bool, layer_params, final_params)
    assert out.shape == (B, N)
    # Tolerance reflects bf16 MXU operands (f32 accumulation) vs. the all-f32 reference.
    np.testing.assert_allclose(np.asarray(out), np.asarray(ref), rtol=2e-2, atol=2e-2)
    print("KERNEL_OK")
</pallas_src>

<mosaic_0001>
module attributes {stable_mosaic.version = 11 : i64} {
  func.func @_fused_encoder_kernel(%arg0: memref<16x32xf32, #tpu.memory_space<vmem>>, %arg1: memref<16x1xf32, #tpu.memory_space<vmem>>, %arg2: memref<1x16xf32, #tpu.memory_space<vmem>>, %arg3: memref<16x16xf32, #tpu.memory_space<vmem>>, %arg4: memref<16x32xf32, #tpu.memory_space<vmem>>, %arg5: memref<2x1x32xf32, #tpu.memory_space<vmem>>, %arg6: memref<2x1x32xf32, #tpu.memory_space<vmem>>, %arg7: memref<2x32x96xbf16, #tpu.memory_space<vmem>>, %arg8: memref<2x1x96xf32, #tpu.memory_space<vmem>>, %arg9: memref<2x32x32xbf16, #tpu.memory_space<vmem>>, %arg10: memref<2x1x32xf32, #tpu.memory_space<vmem>>, %arg11: memref<2x1x32xf32, #tpu.memory_space<vmem>>, %arg12: memref<2x1x32xf32, #tpu.memory_space<vmem>>, %arg13: memref<2x32x64xbf16, #tpu.memory_space<vmem>>, %arg14: memref<2x1x64xf32, #tpu.memory_space<vmem>>, %arg15: memref<2x64x32xbf16, #tpu.memory_space<vmem>>, %arg16: memref<2x1x32xf32, #tpu.memory_space<vmem>>, %arg17: memref<1x32xf32, #tpu.memory_space<vmem>>, %arg18: memref<1x32xf32, #tpu.memory_space<vmem>>, %arg19: memref<1x32xbf16, #tpu.memory_space<vmem>>, %arg20: memref<1x1xf32, #tpu.memory_space<vmem>>, %arg21: memref<1x16xf32, #tpu.memory_space<vmem>>) attributes {dimension_semantics = [], scalar_prefetch = 0 : i64, scratch_operands = 0 : i64, tpu.core_type = #tpu.core_type<tc>} {
    %c0 = arith.constant 0 : index
    %c0_0 = arith.constant 0 : index
    %0 = vector.load %arg0[%c0, %c0_0] : memref<16x32xf32, #tpu.memory_space<vmem>>, vector<16x32xf32>
    %c0_1 = arith.constant 0 : index
    %c0_2 = arith.constant 0 : index
    %1 = vector.load %arg1[%c0_1, %c0_2] : memref<16x1xf32, #tpu.memory_space<vmem>>, vector<16x1xf32>
    %2 = vector.broadcast %1 : vector<16x1xf32> to vector<16x32xf32>
    %3 = arith.mulf %0, %2 : vector<16x32xf32>
    %c0_3 = arith.constant 0 : index
    %c0_4 = arith.constant 0 : index
    %4 = vector.load %arg4[%c0_3, %c0_4] : memref<16x32xf32, #tpu.memory_space<vmem>>, vector<16x32xf32>
    %5 = arith.addf %3, %4 : vector<16x32xf32>
    %c0_5 = arith.constant 0 : index
    %c0_6 = arith.constant 0 : index
    %6 = vector.load %arg3[%c0_5, %c0_6] : memref<16x16xf32, #tpu.memory_space<vmem>>, vector<16x16xf32>
    %7 = arith.truncf %5 : vector<16x32xf32> to vector<16x32xbf16>
    %c0_7 = arith.constant 0 : index
    %c0_8 = arith.constant 0 : index
    %c0_9 = arith.constant 0 : index
    %8 = vector.load %arg7[%c0_7, %c0_8, %c0_9] : memref<2x32x96xbf16, #tpu.memory_space<vmem>>, vector<1x32x96xbf16>
    %9 = vector.shape_cast %8 : vector<1x32x96xbf16> to vector<32x96xbf16>
    %cst = arith.constant dense<0.000000e+00> : vector<16x96xf32>
    %10 = tpu.matmul %7, %9, %cst {dimension_numbers = #tpu.dot_dimension_numbers<[1], [0], [0], [1], [0, 0, 1, 1], [], []>} : vector<16x32xbf16>, vector<32x96xbf16>, vector<16x96xf32> -> vector<16x96xf32>
    %c0_10 = arith.constant 0 : index
    %c0_11 = arith.constant 0 : index
    %c0_12 = arith.constant 0 : index
    %11 = vector.load %arg8[%c0_10, %c0_11, %c0_12] : memref<2x1x96xf32, #tpu.memory_space<vmem>>, vector<1x1x96xf32>
    %12 = vector.shape_cast %11 : vector<1x1x96xf32> to vector<1x96xf32>
    %13 = vector.broadcast %12 : vector<1x96xf32> to vector<16x96xf32>
    %14 = arith.addf %10, %13 : vector<16x96xf32>
    %15 = vector.extract_strided_slice %14 {offsets = [0, 0], sizes = [16, 32], strides = [1, 1]} : vector<16x96xf32> to vector<16x32xf32>
    %cst_13 = arith.constant 0.353553385 : f32
    %16 = vector.broadcast %cst_13 : f32 to vector<16x32xf32>
    %17 = arith.mulf %15, %16 : vector<16x32xf32>
    %18 = arith.truncf %17 : vector<16x32xf32> to vector<16x32xbf16>
    %19 = vector.extract_strided_slice %14 {offsets = [0, 32], sizes = [16, 32], strides = [1, 1]} : vector<16x96xf32> to vector<16x32xf32>
    %20 = arith.truncf %19 : vector<16x32xf32> to vector<16x32xbf16>
    %21 = vector.extract_strided_slice %14 {offsets = [0, 64], sizes = [16, 32], strides = [1, 1]} : vector<16x96xf32> to vector<16x32xf32>
    %22 = arith.truncf %21 : vector<16x32xf32> to vector<16x32xbf16>
    %c0_14 = arith.constant 0 : index
    %c0_15 = arith.constant 0 : index
    %c0_16 = arith.constant 0 : index
    %23 = vector.load %arg9[%c0_14, %c0_15, %c0_16] : memref<2x32x32xbf16, #tpu.memory_space<vmem>>, vector<1x32x32xbf16>
    %24 = vector.shape_cast %23 : vector<1x32x32xbf16> to vector<32x32xbf16>
    %25 = vector.extract_strided_slice %18 {offsets = [0, 0], sizes = [16, 8], strides = [1, 1]} : vector<16x32xbf16> to vector<16x8xbf16>
    %26 = vector.extract_strided_slice %20 {offsets = [0, 0], sizes = [16, 8], strides = [1, 1]} : vector<16x32xbf16> to vector<16x8xbf16>
    %cst_17 = arith.constant dense<0.000000e+00> : vector<16x16xf32>
    %27 = tpu.matmul %25, %26, %cst_17 {dimension_numbers = #tpu.dot_dimension_numbers<[1], [1], [0], [0], [0, 0, 1, 0], [], []>} : vector<16x8xbf16>, vector<16x8xbf16>, vector<16x16xf32> -> vector<16x16xf32>
    %28 = arith.addf %27, %6 : vector<16x16xf32>
    %cst_18 = arith.constant dense<0xFF800000> : vector<16xf32>
    %29 = vector.multi_reduction <maximumf>, %28, %cst_18 [1] : vector<16x16xf32> to vector<16xf32>
    %30 = vector.shape_cast %29 : vector<16xf32> to vector<16x1xf32>
    %31 = vector.broadcast %30 : vector<16x1xf32> to vector<16x16xf32>
    %32 = arith.subf %28, %31 : vector<16x16xf32>
    %33 = math.exp %32 : vector<16x16xf32>
    %cst_19 = arith.constant dense<0.000000e+00> : vector<16xf32>
    %34 = vector.multi_reduction <add>, %33, %cst_19 [1] : vector<16x16xf32> to vector<16xf32>
    %35 = vector.shape_cast %34 : vector<16xf32> to vector<16x1xf32>
    %36 = tpu.reciprocal %35 {approx = true} : vector<16x1xf32> -> vector<16x1xf32>
    %37 = arith.mulf %35, %36 : vector<16x1xf32>
    %cst_20 = arith.constant 2.000000e+00 : f32
    %38 = vector.broadcast %cst_20 : f32 to vector<16x1xf32>
    %39 = arith.subf %38, %37 : vector<16x1xf32>
    %40 = arith.mulf %36, %39 : vector<16x1xf32>
    %41 = vector.broadcast %40 : vector<16x1xf32> to vector<16x16xf32>
    %42 = arith.mulf %33, %41 : vector<16x16xf32>
    %43 = arith.truncf %42 : vector<16x16xf32> to vector<16x16xbf16>
    %44 = vector.extract_strided_slice %22 {offsets = [0, 0], sizes = [16, 8], strides = [1, 1]} : vector<16x32xbf16> to vector<16x8xbf16>
    %cst_21 = arith.constant dense<0.000000e+00> : vector<16x8xf32>
    %45 = tpu.matmul %43, %44, %cst_21 {dimension_numbers = #tpu.dot_dimension_numbers<[1], [0], [0], [1], [0, 0, 1, 1], [], []>} : vector<16x16xbf16>, vector<16x8xbf16>, vector<16x8xf32> -> vector<16x8xf32>
    %46 = arith.truncf %45 : vector<16x8xf32> to vector<16x8xbf16>
    %47 = vector.extract_strided_slice %24 {offsets = [0, 0], sizes = [8, 32], strides = [1, 1]} : vector<32x32xbf16> to vector<8x32xbf16>
    %cst_22 = arith.constant dense<0.000000e+00> : vector<16x32xf32>
    %48 = tpu.matmul %46, %47, %cst_22 {dimension_numbers = #tpu.dot_dimension_numbers<[1], [0], [0], [1], [0, 0, 1, 1], [], []>} : vector<16x8xbf16>, vector<8x32xbf16>, vector<16x32xf32> -> vector<16x32xf32>
    %49 = vector.extract_strided_slice %18 {offsets = [0, 8], sizes = [16, 8], strides = [1, 1]} : vector<16x32xbf16> to vector<16x8xbf16>
    %50 = vector.extract_strided_slice %20 {offsets = [0, 8], sizes = [16, 8], strides = [1, 1]} : vector<16x32xbf16> to vector<16x8xbf16>
    %cst_23 = arith.constant dense<0.000000e+00> : vector<16x16xf32>
    %51 = tpu.matmul %49, %50, %cst_23 {dimension_numbers = #tpu.dot_dimension_numbers<[1], [1], [0], [0], [0, 0, 1, 0], [], []>} : vector<16x8xbf16>, vector<16x8xbf16>, vector<16x16xf32> -> vector<16x16xf32>
    %52 = arith.addf %51, %6 : vector<16x16xf32>
    %cst_24 = arith.constant dense<0xFF800000> : vector<16xf32>
    %53 = vector.multi_reduction <maximumf>, %52, %cst_24 [1] : vector<16x16xf32> to vector<16xf32>
    %54 = vector.shape_cast %53 : vector<16xf32> to vector<16x1xf32>
    %55 = vector.broadcast %54 : vector<16x1xf32> to vector<16x16xf32>
    %56 = arith.subf %52, %55 : vector<16x16xf32>
    %57 = math.exp %56 : vector<16x16xf32>
    %cst_25 = arith.constant dense<0.000000e+00> : vector<16xf32>
    %58 = vector.multi_reduction <add>, %57, %cst_25 [1] : vector<16x16xf32> to vector<16xf32>
    %59 = vector.shape_cast %58 : vector<16xf32> to vector<16x1xf32>
    %60 = tpu.reciprocal %59 {approx = true} : vector<16x1xf32> -> vector<16x1xf32>
    %61 = arith.mulf %59, %60 : vector<16x1xf32>
    %cst_26 = arith.constant 2.000000e+00 : f32
    %62 = vector.broadcast %cst_26 : f32 to vector<16x1xf32>
    %63 = arith.subf %62, %61 : vector<16x1xf32>
    %64 = arith.mulf %60, %63 : vector<16x1xf32>
    %65 = vector.broadcast %64 : vector<16x1xf32> to vector<16x16xf32>
    %66 = arith.mulf %57, %65 : vector<16x16xf32>
    %67 = arith.truncf %66 : vector<16x16xf32> to vector<16x16xbf16>
    %68 = vector.extract_strided_slice %22 {offsets = [0, 8], sizes = [16, 8], strides = [1, 1]} : vector<16x32xbf16> to vector<16x8xbf16>
    %cst_27 = arith.constant dense<0.000000e+00> : vector<16x8xf32>
    %69 = tpu.matmul %67, %68, %cst_27 {dimension_numbers = #tpu.dot_dimension_numbers<[1], [0], [0], [1], [0, 0, 1, 1], [], []>} : vector<16x16xbf16>, vector<16x8xbf16>, vector<16x8xf32> -> vector<16x8xf32>
    %70 = arith.truncf %69 : vector<16x8xf32> to vector<16x8xbf16>
    %71 = vector.extract_strided_slice %24 {offsets = [8, 0], sizes = [8, 32], strides = [1, 1]} : vector<32x32xbf16> to vector<8x32xbf16>
    %cst_28 = arith.constant dense<0.000000e+00> : vector<16x32xf32>
    %72 = tpu.matmul %70, %71, %cst_28 {dimension_numbers = #tpu.dot_dimension_numbers<[1], [0], [0], [1], [0, 0, 1, 1], [], []>} : vector<16x8xbf16>, vector<8x32xbf16>, vector<16x32xf32> -> vector<16x32xf32>
    %73 = arith.addf %48, %72 : vector<16x32xf32>
    %74 = vector.extract_strided_slice %18 {offsets = [0, 16], sizes = [16, 8], strides = [1, 1]} : vector<16x32xbf16> to vector<16x8xbf16>
    %75 = vector.extract_strided_slice %20 {offsets = [0, 16], sizes = [16, 8], strides = [1, 1]} : vector<16x32xbf16> to vector<16x8xbf16>
    %cst_29 = arith.constant dense<0.000000e+00> : vector<16x16xf32>
    %76 = tpu.matmul %74, %75, %cst_29 {dimension_numbers = #tpu.dot_dimension_numbers<[1], [1], [0], [0], [0, 0, 1, 0], [], []>} : vector<16x8xbf16>, vector<16x8xbf16>, vector<16x16xf32> -> vector<16x16xf32>
    %77 = arith.addf %76, %6 : vector<16x16xf32>
    %cst_30 = arith.constant dense<0xFF800000> : vector<16xf32>
    %78 = vector.multi_reduction <maximumf>, %77, %cst_30 [1] : vector<16x16xf32> to vector<16xf32>
    %79 = vector.shape_cast %78 : vector<16xf32> to vector<16x1xf32>
    %80 = vector.broadcast %79 : vector<16x1xf32> to vector<16x16xf32>
    %81 = arith.subf %77, %80 : vector<16x16xf32>
    %82 = math.exp %81 : vector<16x16xf32>
    %cst_31 = arith.constant dense<0.000000e+00> : vector<16xf32>
    %83 = vector.multi_reduction <add>, %82, %cst_31 [1] : vector<16x16xf32> to vector<16xf32>
    %84 = vector.shape_cast %83 : vector<16xf32> to vector<16x1xf32>
    %85 = tpu.reciprocal %84 {approx = true} : vector<16x1xf32> -> vector<16x1xf32>
    %86 = arith.mulf %84, %85 : vector<16x1xf32>
    %cst_32 = arith.constant 2.000000e+00 : f32
    %87 = vector.broadcast %cst_32 : f32 to vector<16x1xf32>
    %88 = arith.subf %87, %86 : vector<16x1xf32>
    %89 = arith.mulf %85, %88 : vector<16x1xf32>
    %90 = vector.broadcast %89 : vector<16x1xf32> to vector<16x16xf32>
    %91 = arith.mulf %82, %90 : vector<16x16xf32>
    %92 = arith.truncf %91 : vector<16x16xf32> to vector<16x16xbf16>
    %93 = vector.extract_strided_slice %22 {offsets = [0, 16], sizes = [16, 8], strides = [1, 1]} : vector<16x32xbf16> to vector<16x8xbf16>
    %cst_33 = arith.constant dense<0.000000e+00> : vector<16x8xf32>
    %94 = tpu.matmul %92, %93, %cst_33 {dimension_numbers = #tpu.dot_dimension_numbers<[1], [0], [0], [1], [0, 0, 1, 1], [], []>} : vector<16x16xbf16>, vector<16x8xbf16>, vector<16x8xf32> -> vector<16x8xf32>
    %95 = arith.truncf %94 : vector<16x8xf32> to vector<16x8xbf16>
    %96 = vector.extract_strided_slice %24 {offsets = [16, 0], sizes = [8, 32], strides = [1, 1]} : vector<32x32xbf16> to vector<8x32xbf16>
    %cst_34 = arith.constant dense<0.000000e+00> : vector<16x32xf32>
    %97 = tpu.matmul %95, %96, %cst_34 {dimension_numbers = #tpu.dot_dimension_numbers<[1], [0], [0], [1], [0, 0, 1, 1], [], []>} : vector<16x8xbf16>, vector<8x32xbf16>, vector<16x32xf32> -> vector<16x32xf32>
    %98 = arith.addf %73, %97 : vector<16x32xf32>
    %99 = vector.extract_strided_slice %18 {offsets = [0, 24], sizes = [16, 8], strides = [1, 1]} : vector<16x32xbf16> to vector<16x8xbf16>
    %100 = vector.extract_strided_slice %20 {offsets = [0, 24], sizes = [16, 8], strides = [1, 1]} : vector<16x32xbf16> to vector<16x8xbf16>
    %cst_35 = arith.constant dense<0.000000e+00> : vector<16x16xf32>
    %101 = tpu.matmul %99, %100, %cst_35 {dimension_numbers = #tpu.dot_dimension_numbers<[1], [1], [0], [0], [0, 0, 1, 0], [], []>} : vector<16x8xbf16>, vector<16x8xbf16>, vector<16x16xf32> -> vector<16x16xf32>
    %102 = arith.addf %101, %6 : vector<16x16xf32>
    %cst_36 = arith.constant dense<0xFF800000> : vector<16xf32>
    %103 = vector.multi_reduction <maximumf>, %102, %cst_36 [1] : vector<16x16xf32> to vector<16xf32>
    %104 = vector.shape_cast %103 : vector<16xf32> to vector<16x1xf32>
    %105 = vector.broadcast %104 : vector<16x1xf32> to vector<16x16xf32>
    %106 = arith.subf %102, %105 : vector<16x16xf32>
    %107 = math.exp %106 : vector<16x16xf32>
    %cst_37 = arith.constant dense<0.000000e+00> : vector<16xf32>
    %108 = vector.multi_reduction <add>, %107, %cst_37 [1] : vector<16x16xf32> to vector<16xf32>
    %109 = vector.shape_cast %108 : vector<16xf32> to vector<16x1xf32>
    %110 = tpu.reciprocal %109 {approx = true} : vector<16x1xf32> -> vector<16x1xf32>
    %111 = arith.mulf %109, %110 : vector<16x1xf32>
    %cst_38 = arith.constant 2.000000e+00 : f32
    %112 = vector.broadcast %cst_38 : f32 to vector<16x1xf32>
    %113 = arith.subf %112, %111 : vector<16x1xf32>
    %114 = arith.mulf %110, %113 : vector<16x1xf32>
    %115 = vector.broadcast %114 : vector<16x1xf32> to vector<16x16xf32>
    %116 = arith.mulf %107, %115 : vector<16x16xf32>
    %117 = arith.truncf %116 : vector<16x16xf32> to vector<16x16xbf16>
    %118 = vector.extract_strided_slice %22 {offsets = [0, 24], sizes = [16, 8], strides = [1, 1]} : vector<16x32xbf16> to vector<16x8xbf16>
    %cst_39 = arith.constant dense<0.000000e+00> : vector<16x8xf32>
    %119 = tpu.matmul %117, %118, %cst_39 {dimension_numbers = #tpu.dot_dimension_numbers<[1], [0], [0], [1], [0, 0, 1, 1], [], []>} : vector<16x16xbf16>, vector<16x8xbf16>, vector<16x8xf32> -> vector<16x8xf32>
    %120 = arith.truncf %119 : vector<16x8xf32> to vector<16x8xbf16>
    %121 = vector.extract_strided_slice %24 {offsets = [24, 0], sizes = [8, 32], strides = [1, 1]} : vector<32x32xbf16> to vector<8x32xbf16>
    %cst_40 = arith.constant dense<0.000000e+00> : vector<16x32xf32>
    %122 = tpu.matmul %120, %121, %cst_40 {dimension_numbers = #tpu.dot_dimension_numbers<[1], [0], [0], [1], [0, 0, 1, 1], [], []>} : vector<16x8xbf16>, vector<8x32xbf16>, vector<16x32xf32> -> vector<16x32xf32>
    %123 = arith.addf %98, %122 : vector<16x32xf32>
    %c0_41 = arith.constant 0 : index
    %c0_42 = arith.constant 0 : index
    %c0_43 = arith.constant 0 : index
    %124 = vector.load %arg10[%c0_41, %c0_42, %c0_43] : memref<2x1x32xf32, #tpu.memory_space<vmem>>, vector<1x1x32xf32>
    %125 = vector.shape_cast %124 : vector<1x1x32xf32> to vector<1x32xf32>
    %126 = vector.broadcast %125 : vector<1x32xf32> to vector<16x32xf32>
    %127 = arith.addf %123, %126 : vector<16x32xf32>
    %128 = arith.addf %127, %5 : vector<16x32xf32>
    %c0_44 = arith.constant 0 : index
    %c0_45 = arith.constant 0 : index
    %c0_46 = arith.constant 0 : index
    %129 = vector.load %arg11[%c0_44, %c0_45, %c0_46] : memref<2x1x32xf32, #tpu.memory_space<vmem>>, vector<1x1x32xf32>
    %130 = vector.shape_cast %129 : vector<1x1x32xf32> to vector<1x32xf32>
    %c0_47 = arith.constant 0 : index
    %c0_48 = arith.constant 0 : index
    %c0_49 = arith.constant 0 : index
    %131 = vector.load %arg12[%c0_47, %c0_48, %c0_49] : memref<2x1x32xf32, #tpu.memory_space<vmem>>, vector<1x1x32xf32>
    %132 = vector.shape_cast %131 : vector<1x1x32xf32> to vector<1x32xf32>
    %cst_50 = arith.constant dense<0.000000e+00> : vector<16xf32>
    %133 = vector.multi_reduction <add>, %128, %cst_50 [1] : vector<16x32xf32> to vector<16xf32>
    %134 = vector.shape_cast %133 : vector<16xf32> to vector<16x1xf32>
    %cst_51 = arith.constant 3.200000e+01 : f32
    %135 = vector.broadcast %cst_51 : f32 to vector<16x1xf32>
    %136 = arith.divf %134, %135 : vector<16x1xf32>
    %137 = vector.broadcast %136 : vector<16x1xf32> to vector<16x32xf32>
    %138 = arith.subf %128, %137 : vector<16x32xf32>
    %139 = arith.mulf %138, %138 : vector<16x32xf32>
    %cst_52 = arith.constant dense<0.000000e+00> : vector<16xf32>
    %140 = vector.multi_reduction <add>, %139, %cst_52 [1] : vector<16x32xf32> to vector<16xf32>
    %141 = vector.shape_cast %140 : vector<16xf32> to vector<16x1xf32>
    %cst_53 = arith.constant 3.200000e+01 : f32
    %142 = vector.broadcast %cst_53 : f32 to vector<16x1xf32>
    %143 = arith.divf %141, %142 : vector<16x1xf32>
    %144 = vector.broadcast %136 : vector<16x1xf32> to vector<16x32xf32>
    %145 = arith.subf %128, %144 : vector<16x32xf32>
    %cst_54 = arith.constant 9.99999997E-7 : f32
    %146 = vector.broadcast %cst_54 : f32 to vector<16x1xf32>
    %147 = arith.addf %143, %146 : vector<16x1xf32>
    %148 = math.rsqrt %147 : vector<16x1xf32>
    %149 = vector.broadcast %148 : vector<16x1xf32> to vector<16x32xf32>
    %150 = arith.mulf %145, %149 : vector<16x32xf32>
    %151 = vector.broadcast %130 : vector<1x32xf32> to vector<16x32xf32>
    %152 = arith.mulf %150, %151 : vector<16x32xf32>
    %153 = vector.broadcast %132 : vector<1x32xf32> to vector<16x32xf32>
    %154 = arith.addf %152, %153 : vector<16x32xf32>
    %155 = arith.truncf %154 : vector<16x32xf32> to vector<16x32xbf16>
    %c0_55 = arith.constant 0 : index
    %c0_56 = arith.constant 0 : index
    %c0_57 = arith.constant 0 : index
    %156 = vector.load %arg13[%c0_55, %c0_56, %c0_57] : memref<2x32x64xbf16, #tpu.memory_space<vmem>>, vector<1x32x64xbf16>
    %157 = vector.shape_cast %156 : vector<1x32x64xbf16> to vector<32x64xbf16>
    %cst_58 = arith.constant dense<0.000000e+00> : vector<16x64xf32>
    %158 = tpu.matmul %155, %157, %cst_58 {dimension_numbers = #tpu.dot_dimension_numbers<[1], [0], [0], [1], [0, 0, 1, 1], [], []>} : vector<16x32xbf16>, vector<32x64xbf16>, vector<16x64xf32> -> vector<16x64xf32>
    %c0_59 = arith.constant 0 : index
    %c0_60 = arith.constant 0 : index
    %c0_61 = arith.constant 0 : index
    %159 = vector.load %arg14[%c0_59, %c0_60, %c0_61] : memref<2x1x64xf32, #tpu.memory_space<vmem>>, vector<1x1x64xf32>
    %160 = vector.shape_cast %159 : vector<1x1x64xf32> to vector<1x64xf32>
    %161 = vector.broadcast %160 : vector<1x64xf32> to vector<16x64xf32>
    %162 = arith.addf %158, %161 : vector<16x64xf32>
    %cst_62 = arith.constant 5.000000e-01 : f32
    %163 = vector.broadcast %cst_62 : f32 to vector<16x64xf32>
    %164 = arith.mulf %163, %162 : vector<16x64xf32>
    %165 = arith.mulf %162, %162 : vector<16x64xf32>
    %166 = arith.mulf %162, %165 : vector<16x64xf32>
    %cst_63 = arith.constant 4.471500e-02 : f32
    %167 = vector.broadcast %cst_63 : f32 to vector<16x64xf32>
    %168 = arith.mulf %167, %166 : vector<16x64xf32>
    %169 = arith.addf %162, %168 : vector<16x64xf32>
    %cst_64 = arith.constant 0.797884583 : f32
    %170 = vector.broadcast %cst_64 : f32 to vector<16x64xf32>
    %171 = arith.mulf %170, %169 : vector<16x64xf32>
    %172 = math.tanh %171 : vector<16x64xf32>
    %cst_65 = arith.constant 1.000000e+00 : f32
    %173 = vector.broadcast %cst_65 : f32 to vector<16x64xf32>
    %174 = arith.addf %173, %172 : vector<16x64xf32>
    %175 = arith.mulf %164, %174 : vector<16x64xf32>
    %176 = arith.truncf %175 : vector<16x64xf32> to vector<16x64xbf16>
    %c0_66 = arith.constant 0 : index
    %c0_67 = arith.constant 0 : index
    %c0_68 = arith.constant 0 : index
    %177 = vector.load %arg15[%c0_66, %c0_67, %c0_68] : memref<2x64x32xbf16, #tpu.memory_space<vmem>>, vector<1x64x32xbf16>
    %178 = vector.shape_cast %177 : vector<1x64x32xbf16> to vector<64x32xbf16>
    %cst_69 = arith.constant dense<0.000000e+00> : vector<16x32xf32>
    %179 = tpu.matmul %176, %178, %cst_69 {dimension_numbers = #tpu.dot_dimension_numbers<[1], [0], [0], [1], [0, 0, 1, 1], [], []>} : vector<16x64xbf16>, vector<64x32xbf16>, vector<16x32xf32> -> vector<16x32xf32>
    %c0_70 = arith.constant 0 : index
    %c0_71 = arith.constant 0 : index
    %c0_72 = arith.constant 0 : index
    %180 = vector.load %arg16[%c0_70, %c0_71, %c0_72] : memref<2x1x32xf32, #tpu.memory_space<vmem>>, vector<1x1x32xf32>
    %181 = vector.shape_cast %180 : vector<1x1x32xf32> to vector<1x32xf32>
    %182 = vector.broadcast %181 : vector<1x32xf32> to vector<16x32xf32>
    %183 = arith.addf %179, %182 : vector<16x32xf32>
    %184 = arith.addf %183, %128 : vector<16x32xf32>
    %c1 = arith.constant 1 : index
    %c0_73 = arith.constant 0 : index
    %c0_74 = arith.constant 0 : index
    %185 = vector.load %arg5[%c1, %c0_73, %c0_74] : memref<2x1x32xf32, #tpu.memory_space<vmem>>, vector<1x1x32xf32>
    %186 = vector.shape_cast %185 : vector<1x1x32xf32> to vector<1x32xf32>
    %c1_75 = arith.constant 1 : index
    %c0_76 = arith.constant 0 : index
    %c0_77 = arith.constant 0 : index
    %187 = vector.load %arg6[%c1_75, %c0_76, %c0_77] : memref<2x1x32xf32, #tpu.memory_space<vmem>>, vector<1x1x32xf32>
    %188 = vector.shape_cast %187 : vector<1x1x32xf32> to vector<1x32xf32>
    %cst_78 = arith.constant dense<0.000000e+00> : vector<16xf32>
    %189 = vector.multi_reduction <add>, %184, %cst_78 [1] : vector<16x32xf32> to vector<16xf32>
    %190 = vector.shape_cast %189 : vector<16xf32> to vector<16x1xf32>
    %cst_79 = arith.constant 3.200000e+01 : f32
    %191 = vector.broadcast %cst_79 : f32 to vector<16x1xf32>
    %192 = arith.divf %190, %191 : vector<16x1xf32>
    %193 = vector.broadcast %192 : vector<16x1xf32> to vector<16x32xf32>
    %194 = arith.subf %184, %193 : vector<16x32xf32>
    %195 = arith.mulf %194, %194 : vector<16x32xf32>
    %cst_80 = arith.constant dense<0.000000e+00> : vector<16xf32>
    %196 = vector.multi_reduction <add>, %195, %cst_80 [1] : vector<16x32xf32> to vector<16xf32>
    %197 = vector.shape_cast %196 : vector<16xf32> to vector<16x1xf32>
    %cst_81 = arith.constant 3.200000e+01 : f32
    %198 = vector.broadcast %cst_81 : f32 to vector<16x1xf32>
    %199 = arith.divf %197, %198 : vector<16x1xf32>
    %200 = vector.broadcast %192 : vector<16x1xf32> to vector<16x32xf32>
    %201 = arith.subf %184, %200 : vector<16x32xf32>
    %cst_82 = arith.constant 9.99999997E-7 : f32
    %202 = vector.broadcast %cst_82 : f32 to vector<16x1xf32>
    %203 = arith.addf %199, %202 : vector<16x1xf32>
    %204 = math.rsqrt %203 : vector<16x1xf32>
    %205 = vector.broadcast %204 : vector<16x1xf32> to vector<16x32xf32>
    %206 = arith.mulf %201, %205 : vector<16x32xf32>
    %207 = vector.broadcast %186 : vector<1x32xf32> to vector<16x32xf32>
    %208 = arith.mulf %206, %207 : vector<16x32xf32>
    %209 = vector.broadcast %188 : vector<1x32xf32> to vector<16x32xf32>
    %210 = arith.addf %208, %209 : vector<16x32xf32>
    %211 = arith.truncf %210 : vector<16x32xf32> to vector<16x32xbf16>
    %c1_83 = arith.constant 1 : index
    %c0_84 = arith.constant 0 : index
    %c0_85 = arith.constant 0 : index
    %212 = vector.load %arg7[%c1_83, %c0_84, %c0_85] : memref<2x32x96xbf16, #tpu.memory_space<vmem>>, vector<1x32x96xbf16>
    %213 = vector.shape_cast %212 : vector<1x32x96xbf16> to vector<32x96xbf16>
    %cst_86 = arith.constant dense<0.000000e+00> : vector<16x96xf32>
    %214 = tpu.matmul %211, %213, %cst_86 {dimension_numbers = #tpu.dot_dimension_numbers<[1], [0], [0], [1], [0, 0, 1, 1], [], []>} : vector<16x32xbf16>, vector<32x96xbf16>, vector<16x96xf32> -> vector<16x96xf32>
    %c1_87 = arith.constant 1 : index
    %c0_88 = arith.constant 0 : index
    %c0_89 = arith.constant 0 : index
    %215 = vector.load %arg8[%c1_87, %c0_88, %c0_89] : memref<2x1x96xf32, #tpu.memory_space<vmem>>, vector<1x1x96xf32>
    %216 = vector.shape_cast %215 : vector<1x1x96xf32> to vector<1x96xf32>
    %217 = vector.broadcast %216 : vector<1x96xf32> to vector<16x96xf32>
    %218 = arith.addf %214, %217 : vector<16x96xf32>
    %219 = vector.extract_strided_slice %218 {offsets = [0, 0], sizes = [16, 32], strides = [1, 1]} : vector<16x96xf32> to vector<16x32xf32>
    %cst_90 = arith.constant 0.353553385 : f32
    %220 = vector.broadcast %cst_90 : f32 to vector<16x32xf32>
    %221 = arith.mulf %219, %220 : vector<16x32xf32>
    %222 = arith.truncf %221 : vector<16x32xf32> to vector<16x32xbf16>
    %223 = vector.extract_strided_slice %218 {offsets = [0, 32], sizes = [16, 32], strides = [1, 1]} : vector<16x96xf32> to vector<16x32xf32>
    %224 = arith.truncf %223 : vector<16x32xf32> to vector<16x32xbf16>
    %225 = vector.extract_strided_slice %218 {offsets = [0, 64], sizes = [16, 32], strides = [1, 1]} : vector<16x96xf32> to vector<16x32xf32>
    %226 = arith.truncf %225 : vector<16x32xf32> to vector<16x32xbf16>
    %c1_91 = arith.constant 1 : index
    %c0_92 = arith.constant 0 : index
    %c0_93 = arith.constant 0 : index
    %227 = vector.load %arg9[%c1_91, %c0_92, %c0_93] : memref<2x32x32xbf16, #tpu.memory_space<vmem>>, vector<1x32x32xbf16>
    %228 = vector.shape_cast %227 : vector<1x32x32xbf16> to vector<32x32xbf16>
    %229 = vector.extract_strided_slice %222 {offsets = [0, 0], sizes = [16, 8], strides = [1, 1]} : vector<16x32xbf16> to vector<16x8xbf16>
    %230 = vector.extract_strided_slice %224 {offsets = [0, 0], sizes = [16, 8], strides = [1, 1]} : vector<16x32xbf16> to vector<16x8xbf16>
    %cst_94 = arith.constant dense<0.000000e+00> : vector<16x16xf32>
    %231 = tpu.matmul %229, %230, %cst_94 {dimension_numbers = #tpu.dot_dimension_numbers<[1], [1], [0], [0], [0, 0, 1, 0], [], []>} : vector<16x8xbf16>, vector<16x8xbf16>, vector<16x16xf32> -> vector<16x16xf32>
    %232 = arith.addf %231, %6 : vector<16x16xf32>
    %cst_95 = arith.constant dense<0xFF800000> : vector<16xf32>
    %233 = vector.multi_reduction <maximumf>, %232, %cst_95 [1] : vector<16x16xf32> to vector<16xf32>
    %234 = vector.shape_cast %233 : vector<16xf32> to vector<16x1xf32>
    %235 = vector.broadcast %234 : vector<16x1xf32> to vector<16x16xf32>
    %236 = arith.subf %232, %235 : vector<16x16xf32>
    %237 = math.exp %236 : vector<16x16xf32>
    %cst_96 = arith.constant dense<0.000000e+00> : vector<16xf32>
    %238 = vector.multi_reduction <add>, %237, %cst_96 [1] : vector<16x16xf32> to vector<16xf32>
    %239 = vector.shape_cast %238 : vector<16xf32> to vector<16x1xf32>
    %240 = tpu.reciprocal %239 {approx = true} : vector<16x1xf32> -> vector<16x1xf32>
    %241 = arith.mulf %239, %240 : vector<16x1xf32>
    %cst_97 = arith.constant 2.000000e+00 : f32
    %242 = vector.broadcast %cst_97 : f32 to vector<16x1xf32>
    %243 = arith.subf %242, %241 : vector<16x1xf32>
    %244 = arith.mulf %240, %243 : vector<16x1xf32>
    %245 = vector.broadcast %244 : vector<16x1xf32> to vector<16x16xf32>
    %246 = arith.mulf %237, %245 : vector<16x16xf32>
    %247 = arith.truncf %246 : vector<16x16xf32> to vector<16x16xbf16>
    %248 = vector.extract_strided_slice %226 {offsets = [0, 0], sizes = [16, 8], strides = [1, 1]} : vector<16x32xbf16> to vector<16x8xbf16>
    %cst_98 = arith.constant dense<0.000000e+00> : vector<16x8xf32>
    %249 = tpu.matmul %247, %248, %cst_98 {dimension_numbers = #tpu.dot_dimension_numbers<[1], [0], [0], [1], [0, 0, 1, 1], [], []>} : vector<16x16xbf16>, vector<16x8xbf16>, vector<16x8xf32> -> vector<16x8xf32>
    %250 = arith.truncf %249 : vector<16x8xf32> to vector<16x8xbf16>
    %251 = vector.extract_strided_slice %228 {offsets = [0, 0], sizes = [8, 32], strides = [1, 1]} : vector<32x32xbf16> to vector<8x32xbf16>
    %cst_99 = arith.constant dense<0.000000e+00> : vector<16x32xf32>
    %252 = tpu.matmul %250, %251, %cst_99 {dimension_numbers = #tpu.dot_dimension_numbers<[1], [0], [0], [1], [0, 0, 1, 1], [], []>} : vector<16x8xbf16>, vector<8x32xbf16>, vector<16x32xf32> -> vector<16x32xf32>
    %253 = vector.extract_strided_slice %222 {offsets = [0, 8], sizes = [16, 8], strides = [1, 1]} : vector<16x32xbf16> to vector<16x8xbf16>
    %254 = vector.extract_strided_slice %224 {offsets = [0, 8], sizes = [16, 8], strides = [1, 1]} : vector<16x32xbf16> to vector<16x8xbf16>
    %cst_100 = arith.constant dense<0.000000e+00> : vector<16x16xf32>
    %255 = tpu.matmul %253, %254, %cst_100 {dimension_numbers = #tpu.dot_dimension_numbers<[1], [1], [0], [0], [0, 0, 1, 0], [], []>} : vector<16x8xbf16>, vector<16x8xbf16>, vector<16x16xf32> -> vector<16x16xf32>
    %256 = arith.addf %255, %6 : vector<16x16xf32>
    %cst_101 = arith.constant dense<0xFF800000> : vector<16xf32>
    %257 = vector.multi_reduction <maximumf>, %256, %cst_101 [1] : vector<16x16xf32> to vector<16xf32>
    %258 = vector.shape_cast %257 : vector<16xf32> to vector<16x1xf32>
    %259 = vector.broadcast %258 : vector<16x1xf32> to vector<16x16xf32>
    %260 = arith.subf %256, %259 : vector<16x16xf32>
    %261 = math.exp %260 : vector<16x16xf32>
    %cst_102 = arith.constant dense<0.000000e+00> : vector<16xf32>
    %262 = vector.multi_reduction <add>, %261, %cst_102 [1] : vector<16x16xf32> to vector<16xf32>
    %263 = vector.shape_cast %262 : vector<16xf32> to vector<16x1xf32>
    %264 = tpu.reciprocal %263 {approx = true} : vector<16x1xf32> -> vector<16x1xf32>
    %265 = arith.mulf %263, %264 : vector<16x1xf32>
    %cst_103 = arith.constant 2.000000e+00 : f32
    %266 = vector.broadcast %cst_103 : f32 to vector<16x1xf32>
    %267 = arith.subf %266, %265 : vector<16x1xf32>
    %268 = arith.mulf %264, %267 : vector<16x1xf32>
    %269 = vector.broadcast %268 : vector<16x1xf32> to vector<16x16xf32>
    %270 = arith.mulf %261, %269 : vector<16x16xf32>
    %271 = arith.truncf %270 : vector<16x16xf32> to vector<16x16xbf16>
    %272 = vector.extract_strided_slice %226 {offsets = [0, 8], sizes = [16, 8], strides = [1, 1]} : vector<16x32xbf16> to vector<16x8xbf16>
    %cst_104 = arith.constant dense<0.000000e+00> : vector<16x8xf32>
    %273 = tpu.matmul %271, %272, %cst_104 {dimension_numbers = #tpu.dot_dimension_numbers<[1], [0], [0], [1], [0, 0, 1, 1], [], []>} : vector<16x16xbf16>, vector<16x8xbf16>, vector<16x8xf32> -> vector<16x8xf32>
    %274 = arith.truncf %273 : vector<16x8xf32> to vector<16x8xbf16>
    %275 = vector.extract_strided_slice %228 {offsets = [8, 0], sizes = [8, 32], strides = [1, 1]} : vector<32x32xbf16> to vector<8x32xbf16>
    %cst_105 = arith.constant dense<0.000000e+00> : vector<16x32xf32>
    %276 = tpu.matmul %274, %275, %cst_105 {dimension_numbers = #tpu.dot_dimension_numbers<[1], [0], [0], [1], [0, 0, 1, 1], [], []>} : vector<16x8xbf16>, vector<8x32xbf16>, vector<16x32xf32> -> vector<16x32xf32>
    %277 = arith.addf %252, %276 : vector<16x32xf32>
    %278 = vector.extract_strided_slice %222 {offsets = [0, 16], sizes = [16, 8], strides = [1, 1]} : vector<16x32xbf16> to vector<16x8xbf16>
    %279 = vector.extract_strided_slice %224 {offsets = [0, 16], sizes = [16, 8], strides = [1, 1]} : vector<16x32xbf16> to vector<16x8xbf16>
    %cst_106 = arith.constant dense<0.000000e+00> : vector<16x16xf32>
    %280 = tpu.matmul %278, %279, %cst_106 {dimension_numbers = #tpu.dot_dimension_numbers<[1], [1], [0], [0], [0, 0, 1, 0], [], []>} : vector<16x8xbf16>, vector<16x8xbf16>, vector<16x16xf32> -> vector<16x16xf32>
    %281 = arith.addf %280, %6 : vector<16x16xf32>
    %cst_107 = arith.constant dense<0xFF800000> : vector<16xf32>
    %282 = vector.multi_reduction <maximumf>, %281, %cst_107 [1] : vector<16x16xf32> to vector<16xf32>
    %283 = vector.shape_cast %282 : vector<16xf32> to vector<16x1xf32>
    %284 = vector.broadcast %283 : vector<16x1xf32> to vector<16x16xf32>
    %285 = arith.subf %281, %284 : vector<16x16xf32>
    %286 = math.exp %285 : vector<16x16xf32>
    %cst_108 = arith.constant dense<0.000000e+00> : vector<16xf32>
    %287 = vector.multi_reduction <add>, %286, %cst_108 [1] : vector<16x16xf32> to vector<16xf32>
    %288 = vector.shape_cast %287 : vector<16xf32> to vector<16x1xf32>
    %289 = tpu.reciprocal %288 {approx = true} : vector<16x1xf32> -> vector<16x1xf32>
    %290 = arith.mulf %288, %289 : vector<16x1xf32>
    %cst_109 = arith.constant 2.000000e+00 : f32
    %291 = vector.broadcast %cst_109 : f32 to vector<16x1xf32>
    %292 = arith.subf %291, %290 : vector<16x1xf32>
    %293 = arith.mulf %289, %292 : vector<16x1xf32>
    %294 = vector.broadcast %293 : vector<16x1xf32> to vector<16x16xf32>
    %295 = arith.mulf %286, %294 : vector<16x16xf32>
    %296 = arith.truncf %295 : vector<16x16xf32> to vector<16x16xbf16>
    %297 = vector.extract_strided_slice %226 {offsets = [0, 16], sizes = [16, 8], strides = [1, 1]} : vector<16x32xbf16> to vector<16x8xbf16>
    %cst_110 = arith.constant dense<0.000000e+00> : vector<16x8xf32>
    %298 = tpu.matmul %296, %297, %cst_110 {dimension_numbers = #tpu.dot_dimension_numbers<[1], [0], [0], [1], [0, 0, 1, 1], [], []>} : vector<16x16xbf16>, vector<16x8xbf16>, vector<16x8xf32> -> vector<16x8xf32>
    %299 = arith.truncf %298 : vector<16x8xf32> to vector<16x8xbf16>
    %300 = vector.extract_strided_slice %228 {offsets = [16, 0], sizes = [8, 32], strides = [1, 1]} : vector<32x32xbf16> to vector<8x32xbf16>
    %cst_111 = arith.constant dense<0.000000e+00> : vector<16x32xf32>
    %301 = tpu.matmul %299, %300, %cst_111 {dimension_numbers = #tpu.dot_dimension_numbers<[1], [0], [0], [1], [0, 0, 1, 1], [], []>} : vector<16x8xbf16>, vector<8x32xbf16>, vector<16x32xf32> -> vector<16x32xf32>
    %302 = arith.addf %277, %301 : vector<16x32xf32>
    %303 = vector.extract_strided_slice %222 {offsets = [0, 24], sizes = [16, 8], strides = [1, 1]} : vector<16x32xbf16> to vector<16x8xbf16>
    %304 = vector.extract_strided_slice %224 {offsets = [0, 24], sizes = [16, 8], strides = [1, 1]} : vector<16x32xbf16> to vector<16x8xbf16>
    %cst_112 = arith.constant dense<0.000000e+00> : vector<16x16xf32>
    %305 = tpu.matmul %303, %304, %cst_112 {dimension_numbers = #tpu.dot_dimension_numbers<[1], [1], [0], [0], [0, 0, 1, 0], [], []>} : vector<16x8xbf16>, vector<16x8xbf16>, vector<16x16xf32> -> vector<16x16xf32>
    %306 = arith.addf %305, %6 : vector<16x16xf32>
    %cst_113 = arith.constant dense<0xFF800000> : vector<16xf32>
    %307 = vector.multi_reduction <maximumf>, %306, %cst_113 [1] : vector<16x16xf32> to vector<16xf32>
    %308 = vector.shape_cast %307 : vector<16xf32> to vector<16x1xf32>
    %309 = vector.broadcast %308 : vector<16x1xf32> to vector<16x16xf32>
    %310 = arith.subf %306, %309 : vector<16x16xf32>
    %311 = math.exp %310 : vector<16x16xf32>
    %cst_114 = arith.constant dense<0.000000e+00> : vector<16xf32>
    %312 = vector.multi_reduction <add>, %311, %cst_114 [1] : vector<16x16xf32> to vector<16xf32>
    %313 = vector.shape_cast %312 : vector<16xf32> to vector<16x1xf32>
    %314 = tpu.reciprocal %313 {approx = true} : vector<16x1xf32> -> vector<16x1xf32>
    %315 = arith.mulf %313, %314 : vector<16x1xf32>
    %cst_115 = arith.constant 2.000000e+00 : f32
    %316 = vector.broadcast %cst_115 : f32 to vector<16x1xf32>
    %317 = arith.subf %316, %315 : vector<16x1xf32>
    %318 = arith.mulf %314, %317 : vector<16x1xf32>
    %319 = vector.broadcast %318 : vector<16x1xf32> to vector<16x16xf32>
    %320 = arith.mulf %311, %319 : vector<16x16xf32>
    %321 = arith.truncf %320 : vector<16x16xf32> to vector<16x16xbf16>
    %322 = vector.extract_strided_slice %226 {offsets = [0, 24], sizes = [16, 8], strides = [1, 1]} : vector<16x32xbf16> to vector<16x8xbf16>
    %cst_116 = arith.constant dense<0.000000e+00> : vector<16x8xf32>
    %323 = tpu.matmul %321, %322, %cst_116 {dimension_numbers = #tpu.dot_dimension_numbers<[1], [0], [0], [1], [0, 0, 1, 1], [], []>} : vector<16x16xbf16>, vector<16x8xbf16>, vector<16x8xf32> -> vector<16x8xf32>
    %324 = arith.truncf %323 : vector<16x8xf32> to vector<16x8xbf16>
    %325 = vector.extract_strided_slice %228 {offsets = [24, 0], sizes = [8, 32], strides = [1, 1]} : vector<32x32xbf16> to vector<8x32xbf16>
    %cst_117 = arith.constant dense<0.000000e+00> : vector<16x32xf32>
    %326 = tpu.matmul %324, %325, %cst_117 {dimension_numbers = #tpu.dot_dimension_numbers<[1], [0], [0], [1], [0, 0, 1, 1], [], []>} : vector<16x8xbf16>, vector<8x32xbf16>, vector<16x32xf32> -> vector<16x32xf32>
    %327 = arith.addf %302, %326 : vector<16x32xf32>
    %c1_118 = arith.constant 1 : index
    %c0_119 = arith.constant 0 : index
    %c0_120 = arith.constant 0 : index
    %328 = vector.load %arg10[%c1_118, %c0_119, %c0_120] : memref<2x1x32xf32, #tpu.memory_space<vmem>>, vector<1x1x32xf32>
    %329 = vector.shape_cast %328 : vector<1x1x32xf32> to vector<1x32xf32>
    %330 = vector.broadcast %329 : vector<1x32xf32> to vector<16x32xf32>
    %331 = arith.addf %327, %330 : vector<16x32xf32>
    %332 = arith.addf %331, %184 : vector<16x32xf32>
    %c1_121 = arith.constant 1 : index
    %c0_122 = arith.constant 0 : index
    %c0_123 = arith.constant 0 : index
    %333 = vector.load %arg11[%c1_121, %c0_122, %c0_123] : memref<2x1x32xf32, #tpu.memory_space<vmem>>, vector<1x1x32xf32>
    %334 = vector.shape_cast %333 : vector<1x1x32xf32> to vector<1x32xf32>
    %c1_124 = arith.constant 1 : index
    %c0_125 = arith.constant 0 : index
    %c0_126 = arith.constant 0 : index
    %335 = vector.load %arg12[%c1_124, %c0_125, %c0_126] : memref<2x1x32xf32, #tpu.memory_space<vmem>>, vector<1x1x32xf32>
    %336 = vector.shape_cast %335 : vector<1x1x32xf32> to vector<1x32xf32>
    %cst_127 = arith.constant dense<0.000000e+00> : vector<16xf32>
    %337 = vector.multi_reduction <add>, %332, %cst_127 [1] : vector<16x32xf32> to vector<16xf32>
    %338 = vector.shape_cast %337 : vector<16xf32> to vector<16x1xf32>
    %cst_128 = arith.constant 3.200000e+01 : f32
    %339 = vector.broadcast %cst_128 : f32 to vector<16x1xf32>
    %340 = arith.divf %338, %339 : vector<16x1xf32>
    %341 = vector.broadcast %340 : vector<16x1xf32> to vector<16x32xf32>
    %342 = arith.subf %332, %341 : vector<16x32xf32>
    %343 = arith.mulf %342, %342 : vector<16x32xf32>
    %cst_129 = arith.constant dense<0.000000e+00> : vector<16xf32>
    %344 = vector.multi_reduction <add>, %343, %cst_129 [1] : vector<16x32xf32> to vector<16xf32>
    %345 = vector.shape_cast %344 : vector<16xf32> to vector<16x1xf32>
    %cst_130 = arith.constant 3.200000e+01 : f32
    %346 = vector.broadcast %cst_130 : f32 to vector<16x1xf32>
    %347 = arith.divf %345, %346 : vector<16x1xf32>
    %348 = vector.broadcast %340 : vector<16x1xf32> to vector<16x32xf32>
    %349 = arith.subf %332, %348 : vector<16x32xf32>
    %cst_131 = arith.constant 9.99999997E-7 : f32
    %350 = vector.broadcast %cst_131 : f32 to vector<16x1xf32>
    %351 = arith.addf %347, %350 : vector<16x1xf32>
    %352 = math.rsqrt %351 : vector<16x1xf32>
    %353 = vector.broadcast %352 : vector<16x1xf32> to vector<16x32xf32>
    %354 = arith.mulf %349, %353 : vector<16x32xf32>
    %355 = vector.broadcast %334 : vector<1x32xf32> to vector<16x32xf32>
    %356 = arith.mulf %354, %355 : vector<16x32xf32>
    %357 = vector.broadcast %336 : vector<1x32xf32> to vector<16x32xf32>
    %358 = arith.addf %356, %357 : vector<16x32xf32>
    %359 = arith.truncf %358 : vector<16x32xf32> to vector<16x32xbf16>
    %c1_132 = arith.constant 1 : index
    %c0_133 = arith.constant 0 : index
    %c0_134 = arith.constant 0 : index
    %360 = vector.load %arg13[%c1_132, %c0_133, %c0_134] : memref<2x32x64xbf16, #tpu.memory_space<vmem>>, vector<1x32x64xbf16>
    %361 = vector.shape_cast %360 : vector<1x32x64xbf16> to vector<32x64xbf16>
    %cst_135 = arith.constant dense<0.000000e+00> : vector<16x64xf32>
    %362 = tpu.matmul %359, %361, %cst_135 {dimension_numbers = #tpu.dot_dimension_numbers<[1], [0], [0], [1], [0, 0, 1, 1], [], []>} : vector<16x32xbf16>, vector<32x64xbf16>, vector<16x64xf32> -> vector<16x64xf32>
    %c1_136 = arith.constant 1 : index
    %c0_137 = arith.constant 0 : index
    %c0_138 = arith.constant 0 : index
    %363 = vector.load %arg14[%c1_136, %c0_137, %c0_138] : memref<2x1x64xf32, #tpu.memory_space<vmem>>, vector<1x1x64xf32>
    %364 = vector.shape_cast %363 : vector<1x1x64xf32> to vector<1x64xf32>
    %365 = vector.broadcast %364 : vector<1x64xf32> to vector<16x64xf32>
    %366 = arith.addf %362, %365 : vector<16x64xf32>
    %cst_139 = arith.constant 5.000000e-01 : f32
    %367 = vector.broadcast %cst_139 : f32 to vector<16x64xf32>
    %368 = arith.mulf %367, %366 : vector<16x64xf32>
    %369 = arith.mulf %366, %366 : vector<16x64xf32>
    %370 = arith.mulf %366, %369 : vector<16x64xf32>
    %cst_140 = arith.constant 4.471500e-02 : f32
    %371 = vector.broadcast %cst_140 : f32 to vector<16x64xf32>
    %372 = arith.mulf %371, %370 : vector<16x64xf32>
    %373 = arith.addf %366, %372 : vector<16x64xf32>
    %cst_141 = arith.constant 0.797884583 : f32
    %374 = vector.broadcast %cst_141 : f32 to vector<16x64xf32>
    %375 = arith.mulf %374, %373 : vector<16x64xf32>
    %376 = math.tanh %375 : vector<16x64xf32>
    %cst_142 = arith.constant 1.000000e+00 : f32
    %377 = vector.broadcast %cst_142 : f32 to vector<16x64xf32>
    %378 = arith.addf %377, %376 : vector<16x64xf32>
    %379 = arith.mulf %368, %378 : vector<16x64xf32>
    %380 = arith.truncf %379 : vector<16x64xf32> to vector<16x64xbf16>
    %c1_143 = arith.constant 1 : index
    %c0_144 = arith.constant 0 : index
    %c0_145 = arith.constant 0 : index
    %381 = vector.load %arg15[%c1_143, %c0_144, %c0_145] : memref<2x64x32xbf16, #tpu.memory_space<vmem>>, vector<1x64x32xbf16>
    %382 = vector.shape_cast %381 : vector<1x64x32xbf16> to vector<64x32xbf16>
    %cst_146 = arith.constant dense<0.000000e+00> : vector<16x32xf32>
    %383 = tpu.matmul %380, %382, %cst_146 {dimension_numbers = #tpu.dot_dimension_numbers<[1], [0], [0], [1], [0, 0, 1, 1], [], []>} : vector<16x64xbf16>, vector<64x32xbf16>, vector<16x32xf32> -> vector<16x32xf32>
    %c1_147 = arith.constant 1 : index
    %c0_148 = arith.constant 0 : index
    %c0_149 = arith.constant 0 : index
    %384 = vector.load %arg16[%c1_147, %c0_148, %c0_149] : memref<2x1x32xf32, #tpu.memory_space<vmem>>, vector<1x1x32xf32>
    %385 = vector.shape_cast %384 : vector<1x1x32xf32> to vector<1x32xf32>
    %386 = vector.broadcast %385 : vector<1x32xf32> to vector<16x32xf32>
    %387 = arith.addf %383, %386 : vector<16x32xf32>
    %388 = arith.addf %387, %332 : vector<16x32xf32>
    %c0_150 = arith.constant 0 : index
    %c0_151 = arith.constant 0 : index
    %389 = vector.load %arg17[%c0_150, %c0_151] : memref<1x32xf32, #tpu.memory_space<vmem>>, vector<1x32xf32>
    %c0_152 = arith.constant 0 : index
    %c0_153 = arith.constant 0 : index
    %390 = vector.load %arg18[%c0_152, %c0_153] : memref<1x32xf32, #tpu.memory_space<vmem>>, vector<1x32xf32>
    %cst_154 = arith.constant dense<0.000000e+00> : vector<16xf32>
    %391 = vector.multi_reduction <add>, %388, %cst_154 [1] : vector<16x32xf32> to vector<16xf32>
    %392 = vector.shape_cast %391 : vector<16xf32> to vector<16x1xf32>
    %cst_155 = arith.constant 3.200000e+01 : f32
    %393 = vector.broadcast %cst_155 : f32 to vector<16x1xf32>
    %394 = arith.divf %392, %393 : vector<16x1xf32>
    %395 = vector.broadcast %394 : vector<16x1xf32> to vector<16x32xf32>
    %396 = arith.subf %388, %395 : vector<16x32xf32>
    %397 = arith.mulf %396, %396 : vector<16x32xf32>
    %cst_156 = arith.constant dense<0.000000e+00> : vector<16xf32>
    %398 = vector.multi_reduction <add>, %397, %cst_156 [1] : vector<16x32xf32> to vector<16xf32>
    %399 = vector.shape_cast %398 : vector<16xf32> to vector<16x1xf32>
    %cst_157 = arith.constant 3.200000e+01 : f32
    %400 = vector.broadcast %cst_157 : f32 to vector<16x1xf32>
    %401 = arith.divf %399, %400 : vector<16x1xf32>
    %402 = vector.broadcast %394 : vector<16x1xf32> to vector<16x32xf32>
    %403 = arith.subf %388, %402 : vector<16x32xf32>
    %cst_158 = arith.constant 9.99999997E-7 : f32
    %404 = vector.broadcast %cst_158 : f32 to vector<16x1xf32>
    %405 = arith.addf %401, %404 : vector<16x1xf32>
    %406 = math.rsqrt %405 : vector<16x1xf32>
    %407 = vector.broadcast %406 : vector<16x1xf32> to vector<16x32xf32>
    %408 = arith.mulf %403, %407 : vector<16x32xf32>
    %409 = vector.broadcast %389 : vector<1x32xf32> to vector<16x32xf32>
    %410 = arith.mulf %408, %409 : vector<16x32xf32>
    %411 = vector.broadcast %390 : vector<1x32xf32> to vector<16x32xf32>
    %412 = arith.addf %410, %411 : vector<16x32xf32>
    %c0_159 = arith.constant 0 : index
    %c0_160 = arith.constant 0 : index
    %413 = vector.load %arg19[%c0_159, %c0_160] : memref<1x32xbf16, #tpu.memory_space<vmem>>, vector<1x32xbf16>
    %414 = arith.truncf %412 : vector<16x32xf32> to vector<16x32xbf16>
    %cst_161 = arith.constant dense<0.000000e+00> : vector<1x16xf32>
    %415 = tpu.matmul %413, %414, %cst_161 {dimension_numbers = #tpu.dot_dimension_numbers<[1], [1], [0], [0], [0, 0, 1, 0], [], []>} : vector<1x32xbf16>, vector<16x32xbf16>, vector<1x16xf32> -> vector<1x16xf32>
    %c0_162 = arith.constant 0 : index
    %c0_163 = arith.constant 0 : index
    %416 = vector.load %arg20[%c0_162, %c0_163] : memref<1x1xf32, #tpu.memory_space<vmem>>, vector<1x1xf32>
    %417 = vector.broadcast %416 : vector<1x1xf32> to vector<1x16xf32>
    %418 = arith.addf %415, %417 : vector<1x16xf32>
    %419 = arith.negf %418 : vector<1x16xf32>
    %420 = math.exp %419 : vector<1x16xf32>
    %cst_164 = arith.constant 1.000000e+00 : f32
    %421 = vector.broadcast %cst_164 : f32 to vector<1x16xf32>
    %422 = arith.addf %421, %420 : vector<1x16xf32>
    %423 = arith.divf %421, %422 : vector<1x16xf32>
    %c0_165 = arith.constant 0 : index
    %c0_166 = arith.constant 0 : index
    %424 = vector.load %arg2[%c0_165, %c0_166] : memref<1x16xf32, #tpu.memory_space<vmem>>, vector<1x16xf32>
    %425 = arith.mulf %423, %424 : vector<1x16xf32>
    %c0_167 = arith.constant 0 : index
    %c0_168 = arith.constant 0 : index
    %426 = vector.load %arg21[%c0_167, %c0_168] : memref<1x16xf32, #tpu.memory_space<vmem>>, vector<1x16xf32>
    tpu.vector_store %arg21[%c0_167, %c0_168], %425 {strides = array<i32>} : memref<1x16xf32, #tpu.memory_space<vmem>>, vector<1x16xf32>,
    return
  }
}

</mosaic_0001>

<bundles_post_ra>
// kernel: ext_transformer_encoder.1
= control target key start
LH: loop header
LB: loop body
LE: loop exit
PB: predicated region body
PF: predicated region fallthrough
CT: control target
= control target key end

     0   :  { %v2780_v0 = vmov 0   ;;  %v2781_v4 = vmov 0.0   ;;  %vm2782_vm0 = vmmov 0   ;;  %vm117_vm1 = vcmask 261120   ;;  %s2783_s30 = smov 96   ;;  %s2785_s22 = smov 88   ;;  %s3393_s1 = inlined_call_operand.vmem [shape: f32[16,1], index: 1, kind: input, shape index: {}]   ;;  %s3394_s7 = inlined_call_operand.vmem [shape: bf16[2,32,96], index: 7, kind: input, shape index: {}]   ;;  %s3395_s0 = inlined_call_operand.vmem [shape: f32[16,32], index: 0, kind: input, shape index: {}]   ;;  %s3396_s4 = inlined_call_operand.vmem [shape: f32[16,32], index: 4, kind: input, shape index: {}]   ;;  %s3397_s8 = inlined_call_operand.vmem [shape: f32[2,1,96], index: 8, kind: input, shape index: {}]   ;;  %s3398_s3 = inlined_call_operand.vmem [shape: f32[16,16], index: 3, kind: input, shape index: {}]   ;;  %s3399_s9 = inlined_call_operand.vmem [shape: bf16[2,32,32], index: 9, kind: input, shape index: {}]   ;;  %s3400_s10 = inlined_call_operand.vmem [shape: f32[2,1,32], index: 10, kind: input, shape index: {}]   ;;  %s3401_s13 = inlined_call_operand.vmem [shape: bf16[2,32,64], index: 13, kind: input, shape index: {}]   ;;  %s3402_s11 = inlined_call_operand.vmem [shape: f32[2,1,32], index: 11, kind: input, shape index: {}]   ;;  %s3403_s12 = inlined_call_operand.vmem [shape: f32[2,1,32], index: 12, kind: input, shape index: {}]   ;;  %s3404_s15 = inlined_call_operand.vmem [shape: bf16[2,64,32], index: 15, kind: input, shape index: {}]   ;;  %s3405_s14 = inlined_call_operand.vmem [shape: f32[2,1,64], index: 14, kind: input, shape index: {}]   ;;  %s3406_s16 = inlined_call_operand.vmem [shape: f32[2,1,32], index: 16, kind: input, shape index: {}]   ;;  %s3407_s5 = inlined_call_operand.vmem [shape: f32[2,1,32], index: 5, kind: input, shape index: {}]   ;;  %s3408_s6 = inlined_call_operand.vmem [shape: f32[2,1,32], index: 6, kind: input, shape index: {}]   ;;  %s3409_s20 = inlined_call_operand.<no memory space> [shape: f32[1,1], index: 20, kind: input, shape index: {}]   ;;  %s3410_s17 = inlined_call_operand.vmem [shape: f32[1,32], index: 17, kind: input, shape index: {}]   ;;  %s3411_s18 = inlined_call_operand.vmem [shape: f32[1,32], index: 18, kind: input, shape index: {}]   ;;  %s3412_s19 = inlined_call_operand.vmem [shape: bf16[1,32], index: 19, kind: input, shape index: {}]   ;;  %s3413_s2 = inlined_call_operand.vmem [shape: f32[1,16], index: 2, kind: input, shape index: {}]   ;;  %s3414_s21 = inlined_call_operand.vmem [shape: f32[1,16], index: 21, kind: output, shape index: {}]  }
   0x1   :  { %3427 = sst [smem:[#allocation3_spill]] %s3393_s1  ;;  %2669 = vset.pattern.permute.xlu0 %v2780_v0  ;;  %2449 = vmatprep.subr.bf16.mxu0 %v2781_v4  ;;  %vm173_vm2 = vcmask 64512   ;;  %vm221_vm3 = vcmask 130048   ;;  %s2787_s27 = smov 64   ;;  %vm431_vm4 = vcmask 1043456   ;;  %vm1059_vm5 = vcmask 523264  }
   0x2   :  { %3428 = sst [smem:[#allocation4_spill]] %s3394_s7  ;;  %s3433_s26 = sld [smem:[#allocation3_spill]]  ;;  %2457 = vmatprep.subr.bf16.mxu1 %v2781_v4  ;;  %2453 = vmatprep.mubr.msk.bf16.mxu0 %vm2782_vm0, %v2781_v4  ;;  %vm2279_vm6 = vcmask 122880  }
   0x3   :  { %3429 = sst [smem:[#allocation5_spill]] %s3395_s0  ;;  %s3434_s1 = sld [smem:[#allocation4_spill]]  ;;  %2459 = vmatprep.mubr.msk.bf16.mxu1 %vm2782_vm0, %v2781_v4 }
   0x4   :  { %3430 = sst [smem:[#allocation6_spill]] %s3396_s4  ;;  %s3435_s23 = sld [smem:[#allocation5_spill]] }
   0x5   :  { %3431 = sst [smem:[#allocation7_spill]] %s3397_s8  ;;  %s3426_s4 = smov 80  }
   0x6   :  { %3432 = sst [smem:[#allocation8_spill]] %s3398_s3  ;;  %s3437_s8 = sld [smem:[#allocation7_spill]] }
   0x7   :  { %s2784_s3 = smov 120   ;;  %s3438_s24 = sld [smem:[#allocation8_spill]] }
   0x8   :  { %v73_v1 = vld [vmem:[%s3433_s26] sm:$0xff]  ;;  %v74_v2 = vld [vmem:[%s3433_s26 + $0x8] sm:$0xff]  ;;  %s3436_s26 = sld [smem:[#allocation6_spill]]  ;;  %s3425_s28 = smov 112  }
   0x9   :  { %77 = vperm.xlu0 %2669, %v73_v1   ;;  %v2670_v3 = vld [vmem:[%s3434_s1] sm:$0xff]   ;;  %v2671_v5 = vld [vmem:[%s3434_s1 + $0x8] sm:$0xff]   ;;  %s3424_s25 = smov 72   ;;  %s3423_s29 = smov 48  }
   0xa   :  { %2450 = vmatpush3.bf16.msra.mxu0 %v2670_v3  ;;  %v71_v7 = vld [vmem:[%s3435_s23] sm:$0xff]  ;;  %v72_v8 = vld [vmem:[%s3435_s23 + $0x8] sm:$0xff]  ;;  %s3422_s23 = smov 104   ;;  %s3421_s7 = smov 40  }
   0xb   :  { %2451 = vmatprep.subr.bf16.mxu0 %v2781_v4 }
   0xc   :  { %v2285_v17 = vld [vmem:[%s3437_s8] ss:$0 sm:$0xff] }
   0xd   :  { %82 = vperm.xlu0 %2669, %v74_v2   ;;  %v2972_v33 = vld [vmem:[%s3438_s24] sm:$0xff]  ;;  %v2977_v35 = vld [vmem:[%s3438_s24 + $0x8] sm:$0xff] }
   0xe   :  { %2452 = vmatpush3.bf16.msra.mxu0 %v2671_v5  ;;  %v87_v10 = vld [vmem:[%s3436_s26] sm:$0xff]  ;;  %v88_v11 = vld [vmem:[%s3436_s26 + $0x8] sm:$0xff]  ;;  %s2786_s26 = smov 56  }
   0xf   :  { %2463 = vmatprep.subr.bf16.mxu0 %v2781_v4 }
  0x88   :  { %v78_v6 = vpop.permute.xlu0 %77 }
  0x89   :  { %v85_v9 = vmul.f32 %v78_v6, %v71_v7 }
  0x8b   :  { %v2936_v14 = vadd.f32 %v87_v10, %v85_v9 }
  0x8c   :  { %v83_v12 = vpop.permute.xlu0 %82 }
  0x8d   :  { %v86_v13 = vmul.f32 %v83_v12, %v72_v8 }
  0x8f   :  { %v2938_v15 = vadd.f32 %v88_v11, %v86_v13 }
  0x91   :  { %v93_v16 = vpack.c.bf16 %v2938_v15, %v2936_v14 }
  0x93   :  { %2454 = vmatmul.mubr.msk.bf16.vlgmr.msra.gmra.mrb[0].mxu0 %vm117_vm1, %v93_v16 }
  0x94   :  { %2465 = vmatprep.mubr.msk.bf16.mxu0 %vm2782_vm0, %v2781_v4 }
 0x166   :  { %v155_v18 = vpop.f32.mrb[0].mxu0 }
 0x167   :  { %v156_v19 = vadd.f32 %v2285_v17, %v155_v18  ;;  %v2455_v20 = vpop.f32.mrb[1].mxu0 }
 0x168   :  { %v158_v21 = vpop.f32.mrb[2].mxu0 }
 0x169   :  { %v159_v22 = vadd.f32 %v2285_v17, %v158_v21  ;;  %v2456_v23 = vpop.f32.mrb[3].mxu0  ;;  %v162_v24 = vmul.f32 0.35355338, %v156_v19 }
 0x16b   :  { %v163_v25 = vmul.f32 0.35355338, %v159_v22  ;;  %v2948_v26 = vpack.c.bf16 %v159_v22, %v156_v19 }
 0x16d   :  { %v2950_v27 = vpack.c.bf16 %v163_v25, %v162_v24  ;;  %171 = vrot.lane.b32.xlu1 %v2948_v26, %s2783_s30 }
 0x16f   :  { %300 = vrot.lane.b32.xlu0 %v2950_v27, %s2784_s3 }
 0x171   :  { %302 = vrot.lane.b32.xlu1 %v2948_v26, %s2785_s22 }
 0x1df   :  { %v172_v28 = vpop.permute.xlu1 %171 }
 0x1e0   :  { %v178_v29 = vsel %vm173_vm2, %v172_v28, 0 }
 0x1e1   :  { %2458 = vmatpush3.bf16.xpose.msra.mxu1 %v178_v29  ;;  %v301_v32 = vpop.permute.xlu0 %300 }
 0x1e2   :  { %2469 = vmatprep.subr.bf16.mxu1 %v2781_v4 }
 0x1e3   :  { %v303_v30 = vpop.permute.xlu1 %302 }
 0x1e4   :  { %v308_v31 = vsel %vm173_vm2, %v303_v30, 0 }
 0x1e8   :  { %2460 = vmatmul.mubr.msk.bf16.vlgmr.msra.gmra.mrb[0].mxu1 %vm173_vm2, %v2950_v27 }
 0x1e9   :  { %2470 = vmatpush3.bf16.xpose.msra.mxu1 %v308_v31  ;;  %2471 = vmatprep.mubr.msk.bf16.mxu1 %vm2782_vm0, %v2781_v4 }
 0x1ea   :  { %2481 = vmatprep.subr.bf16.mxu1 %v2781_v4 }
 0x1f0   :  { %2472 = vmatmul.mubr.msk.bf16.vlgmr.msra.gmra.mrb[4].mxu1 %vm173_vm2, %v301_v32 }
 0x1f1   :  { %2483 = vmatprep.mubr.msk.bf16.mxu1 %vm2782_vm0, %v2781_v4 }
 0x2bb   :  { %v214_v34 = vpop.f32.mrb[0].mxu1 }
 0x2bc   :  { %v215_v36 = vadd.f32 %v214_v34, %v2972_v33  ;;  %v2461_v37 = vpop.f32.mrb[1].mxu1 }
 0x2bd   :  { %v217_v38 = vpop.f32.mrb[2].mxu1 }
 0x2be   :  { %v218_v39 = vadd.f32 %v217_v38, %v2977_v35  ;;  %v2462_v40 = vpop.f32.mrb[3].mxu1  ;;  %v222_v41 = vsel %vm221_vm3, %v215_v36, -inf }
 0x2bf   :  { %223 = vmax.xlane.f32.xlu1 %v222_v41 }
 0x2c0   :  { %v225_v42 = vsel %vm221_vm3, %v218_v39, -inf }
 0x2c1   :  { %226 = vmax.xlane.f32.xlu0 %v225_v42  ;;  %v166_v42 = vld [vmem:[%s3399_s9] sm:$0xf] }
 0x2c3   :  { %v344_v43 = vpop.f32.mrb[4].mxu1 }
 0x2c4   :  { %v345_v44 = vadd.f32 %v344_v43, %v2972_v33  ;;  %v2473_v45 = vpop.f32.mrb[5].mxu1  ;;  %v480_v43 = vsel %vm431_vm4, %v166_v42, 0 }
 0x2c5   :  { %v347_v46 = vpop.f32.mrb[6].mxu1 }
 0x2c6   :  { %v348_v47 = vadd.f32 %v347_v46, %v2977_v35  ;;  %v2474_v48 = vpop.f32.mrb[7].mxu1  ;;  %v351_v49 = vsel %vm221_vm3, %v345_v44, -inf }
 0x2c7   :  { %352 = vmax.xlane.f32.xlu0 %v351_v49 }
 0x2c8   :  { %v354_v50 = vsel %vm221_vm3, %v348_v47, -inf }
 0x2c9   :  { %355 = vmax.xlane.f32.xlu1 %v354_v50 }
 0x34c   :  { %v224_v51 = vpop.xlane.xlu1 %223 }
 0x34d   :  { %v228_v52 = vsub.f32 %v215_v36, %v224_v51 }
 0x34e   :  { %v227_v53 = vpop.xlane.xlu0 %226 }
 0x34f   :  { %v230_v54 = vmul.f32 1.442695, %v228_v52  ;;  %v229_v55 = vsub.f32 %v218_v39, %v227_v53 }
 0x351   :  { %2686 = vpow2.f32 %v230_v54  ;;  %v232_v56 = vmul.f32 1.442695, %v229_v55 }
 0x353   :  { %2688 = vpow2.f32 %v232_v56 }
 0x354   :  { %v353_v57 = vpop.xlane.xlu0 %352 }
 0x355   :  { %v357_v58 = vsub.f32 %v345_v44, %v353_v57  ;;  %v167_v44 = vld [vmem:[%s3399_s9 + $0x4] sm:$0xf] }
 0x356   :  { %v356_v59 = vpop.xlane.xlu1 %355  ;;  %v433_v45 = vsel %vm431_vm4, %v167_v44, 0 }
 0x357   :  { %v359_v60 = vmul.f32 1.442695, %v357_v58  ;;  %v358_v61 = vsub.f32 %v348_v47, %v356_v59  ;;  %2482 = vmatpush3.bf16.msra.mxu1 %v433_v45 }
 0x358   :  { %2493 = vmatprep.subr.bf16.mxu1 %v2781_v4 }
 0x359   :  { %2690 = vpow2.f32 %v359_v60  ;;  %v361_v62 = vmul.f32 1.442695, %v358_v61 }
 0x35b   :  { %v2687_v63 = vpop.eup %2686  ;;  %2692 = vpow2.f32 %v361_v62 }
 0x35c   :  { %v234_v0 = vsel %vm221_vm3, %v2687_v63, 0.0 }
 0x35d   :  { %v2689_v1 = vpop.eup %2688  ;;  %235 = vadd.xlane.f32.xlu0 %v234_v0 }
 0x35e   :  { %v237_v2 = vsel %vm221_vm3, %v2689_v1, 0.0 }
 0x35f   :  { %238 = vadd.xlane.f32.xlu1 %v237_v2 }
 0x363   :  { %v2691_v3 = vpop.eup %2690 }
 0x364   :  { %v363_v5 = vsel %vm221_vm3, %v2691_v3, 0.0 }
 0x365   :  { %v2693_v6 = vpop.eup %2692  ;;  %364 = vadd.xlane.f32.xlu0 %v363_v5 }
 0x366   :  { %v366_v7 = vsel %vm221_vm3, %v2693_v6, 0.0 }
 0x367   :  { %367 = vadd.xlane.f32.xlu1 %v366_v7 }
 0x378   :  { %380 = vrot.lane.b32.xlu1 %v2948_v26, %s2786_s26 }
 0x37b   :  { %251 = vrot.lane.b32.xlu0 %v2948_v26, %s2787_s27 }
 0x37c   :  { %525 = vrot.lane.b32.xlu1 %v2948_v26, %s3426_s4  ;;  %s3443_s4 = smov 104  }
 0x37f   :  { %523 = vrot.lane.b32.xlu0 %v2950_v27, %s3425_s28 }
 0x3ea   :  { %v236_v8 = vpop.xlane.xlu0 %235 }
 0x3eb   :  { %2694 = vrcp.f32 %v236_v8 }
 0x3ec   :  { %v239_v9 = vpop.xlane.xlu1 %238 }
 0x3ed   :  { %2696 = vrcp.f32 %v239_v9 }
 0x3f2   :  { %v365_v10 = vpop.xlane.xlu0 %364 }
 0x3f3   :  { %2698 = vrcp.f32 %v365_v10 }
 0x3f4   :  { %v368_v11 = vpop.xlane.xlu1 %367 }
 0x3f5   :  { %v2695_v12 = vpop.eup %2694  ;;  %2700 = vrcp.f32 %v368_v11 }
 0x3f6   :  { %v242_v13 = vmul.f32 %v2695_v12, %v236_v8  ;;  %v252_v16 = vpop.permute.xlu0 %251 }
 0x3f7   :  { %v2697_v17 = vpop.eup %2696  ;;  %2464 = vmatpush3.bf16.msra.mxu0 %v252_v16 }
 0x3f8   :  { %v244_v18 = vsub.f32 2.0, %v242_v13  ;;  %v243_v19 = vmul.f32 %v2697_v17, %v239_v9  ;;  %2475 = vmatprep.subr.bf16.mxu0 %v2781_v4  ;;  %v381_v37 = vpop.permute.xlu1 %380 }
 0x3fa   :  { %v246_v20 = vmul.f32 %v2695_v12, %v244_v18  ;;  %v245_v21 = vsub.f32 2.0, %v243_v19  ;;  %v524_v58 = vpop.permute.xlu0 %523 }
 0x3fc   :  { %v247_v22 = vmul.f32 %v2697_v17, %v245_v21  ;;  %v248_v24 = vmul.f32 %v2687_v63, %v246_v20  ;;  %v526_v53 = vpop.permute.xlu1 %525 }
 0x3fd   :  { %v2699_v23 = vpop.eup %2698  ;;  %v531_v57 = vsel %vm173_vm2, %v526_v53, 0 }
 0x3fe   :  { %v249_v25 = vmul.f32 %v2689_v1, %v247_v22  ;;  %v371_v28 = vmul.f32 %v2699_v23, %v365_v10 }
 0x3ff   :  { %v2701_v29 = vpop.eup %2700 }
 0x400   :  { %v250_v30 = vpack.c.bf16 %v249_v25, %v248_v24  ;;  %v373_v31 = vsub.f32 2.0, %v371_v28  ;;  %v372_v32 = vmul.f32 %v2701_v29, %v368_v11 }
 0x402   :  { %v375_v34 = vmul.f32 %v2699_v23, %v373_v31  ;;  %v374_v36 = vsub.f32 2.0, %v372_v32  ;;  %2466 = vmatmul.mubr.msk.bf16.vlgmr.msra.gmra.mrb[4].mxu0 %vm221_vm3, %v250_v30 }
 0x403   :  { %2476 = vmatpush3.bf16.msra.mxu0 %v381_v37  ;;  %2477 = vmatprep.mubr.msk.bf16.mxu0 %vm2782_vm0, %v2781_v4 }
 0x404   :  { %v376_v38 = vmul.f32 %v2701_v29, %v374_v36  ;;  %2487 = vmatprep.subr.bf16.mxu0 %v2781_v4  ;;  %v377_v39 = vmul.f32 %v2691_v3, %v375_v34 }
 0x406   :  { %v378_v40 = vmul.f32 %v2693_v6, %v376_v38 }
 0x408   :  { %v379_v41 = vpack.c.bf16 %v378_v40, %v377_v39 }
 0x40a   :  { %2478 = vmatmul.mubr.msk.bf16.vlgmr.msra.gmra.mrb[8].mxu0 %vm221_vm3, %v379_v41 }
 0x40b   :  { %2489 = vmatprep.mubr.msk.bf16.mxu0 %vm2782_vm0, %v2781_v4  ;;  %2488 = vmatpush3.bf16.msra.mxu0 %v480_v43 }
 0x40c   :  { %2499 = vmatprep.subr.bf16.mxu0 %v2781_v4 }
 0x4d5   :  { %v291_v46 = vpop.f32.mrb[4].mxu0 }
 0x4d6   :  { %v2467_v47 = vpop.f32.mrb[5].mxu0 }
 0x4d7   :  { %v294_v48 = vpop.f32.mrb[6].mxu0 }
 0x4d8   :  { %v298_v49 = vpack.c.bf16 %v294_v48, %v291_v46  ;;  %v2468_v50 = vpop.f32.mrb[7].mxu0  ;;  %v168_v46 = vld [vmem:[%s3399_s9 + $0x8] sm:$0xf] }
 0x4d9   :  { %v655_v47 = vsel %vm431_vm4, %v168_v46, 0 }
 0x4da   :  { %2490 = vmatmul.mubr.msk.bf16.vlgmr.msra.gmra.mrb[12].mxu0 %vm173_vm2, %v298_v49 }
 0x4db   :  { %2501 = vmatprep.mubr.msk.bf16.mxu0 %vm2782_vm0, %v2781_v4 }
 0x4dd   :  { %v420_v51 = vpop.f32.mrb[8].mxu0 }
 0x4de   :  { %v2479_v52 = vpop.f32.mrb[9].mxu0 }
 0x4df   :  { %v423_v54 = vpop.f32.mrb[10].mxu0 }
 0x4e0   :  { %v427_v55 = vpack.c.bf16 %v423_v54, %v420_v51  ;;  %v2480_v56 = vpop.f32.mrb[11].mxu0 }
 0x4e2   :  { %2484 = vmatmul.mubr.msk.bf16.vlgmr.msra.gmra.mrb[8].mxu1 %vm173_vm2, %v427_v55 }
 0x4e3   :  { %2494 = vmatpush3.bf16.xpose.msra.mxu1 %v531_v57  ;;  %2495 = vmatprep.mubr.msk.bf16.mxu1 %vm2782_vm0, %v2781_v4 }
 0x4e4   :  { %2505 = vmatprep.subr.bf16.mxu1 %v2781_v4 }
 0x4ea   :  { %2496 = vmatmul.mubr.msk.bf16.vlgmr.msra.gmra.mrb[12].mxu1 %vm173_vm2, %v524_v58 }
 0x4eb   :  { %2507 = vmatprep.mubr.msk.bf16.mxu1 %vm2782_vm0, %v2781_v4  ;;  %2506 = vmatpush3.bf16.msra.mxu1 %v655_v47 }
 0x4ec   :  { %2517 = vmatprep.subr.bf16.mxu1 %v2781_v4 }
 0x5ad   :  { %v516_v59 = vpop.f32.mrb[12].mxu0 }
 0x5ae   :  { %v2491_v60 = vpop.f32.mrb[13].mxu0 }
 0x5af   :  { %v519_v61 = vpop.f32.mrb[14].mxu0 }
 0x5b0   :  { %v2492_v62 = vpop.f32.mrb[15].mxu0 }
 0x5b5   :  { %v469_v63 = vpop.f32.mrb[8].mxu1 }
 0x5b6   :  { %v3028_v0 = vadd.f32 %v516_v59, %v469_v63  ;;  %v2485_v1 = vpop.f32.mrb[9].mxu1 }
 0x5b7   :  { %v472_v2 = vpop.f32.mrb[10].mxu1 }
 0x5b8   :  { %v3030_v3 = vadd.f32 %v519_v61, %v472_v2  ;;  %v2486_v5 = vpop.f32.mrb[11].mxu1 }
 0x5bd   :  { %v567_v6 = vpop.f32.mrb[12].mxu1 }
 0x5be   :  { %v568_v7 = vadd.f32 %v567_v6, %v2972_v33  ;;  %v2497_v8 = vpop.f32.mrb[13].mxu1 }
 0x5bf   :  { %v570_v9 = vpop.f32.mrb[14].mxu1 }
 0x5c0   :  { %v571_v10 = vadd.f32 %v570_v9, %v2977_v35  ;;  %v2498_v11 = vpop.f32.mrb[15].mxu1  ;;  %v574_v12 = vsel %vm221_vm3, %v568_v7, -inf }
 0x5c1   :  { %575 = vmax.xlane.f32.xlu1 %v574_v12 }
 0x5c2   :  { %v577_v13 = vsel %vm221_vm3, %v571_v10, -inf }
 0x5c3   :  { %578 = vmax.xlane.f32.xlu0 %v577_v13 }
 0x64e   :  { %v576_v16 = vpop.xlane.xlu1 %575 }
 0x64f   :  { %v580_v17 = vsub.f32 %v568_v7, %v576_v16 }
 0x650   :  { %v579_v18 = vpop.xlane.xlu0 %578 }
 0x651   :  { %v582_v19 = vmul.f32 1.442695, %v580_v17  ;;  %v581_v20 = vsub.f32 %v571_v10, %v579_v18 }
 0x653   :  { %2702 = vpow2.f32 %v582_v19  ;;  %v584_v21 = vmul.f32 1.442695, %v581_v20 }
 0x655   :  { %2704 = vpow2.f32 %v584_v21 }
 0x65d   :  { %v2703_v22 = vpop.eup %2702 }
 0x65e   :  { %v586_v23 = vsel %vm221_vm3, %v2703_v22, 0.0 }
 0x65f   :  { %v2705_v24 = vpop.eup %2704  ;;  %587 = vadd.xlane.f32.xlu0 %v586_v23 }
 0x660   :  { %v589_v25 = vsel %vm221_vm3, %v2705_v24, 0.0 }
 0x661   :  { %590 = vadd.xlane.f32.xlu1 %v589_v25 }
 0x672   :  { %702 = vrot.lane.b32.xlu1 %v2948_v26, %s3424_s25 }
 0x675   :  { %603 = vrot.lane.b32.xlu0 %v2948_v26, %s3423_s29  ;;  %s3444_s29 = smov 40  }
 0x676   :  { %700 = vrot.lane.b32.xlu1 %v2950_v27, %s3422_s23 }
 0x6ec   :  { %v588_v28 = vpop.xlane.xlu0 %587 }
 0x6ed   :  { %2706 = vrcp.f32 %v588_v28 }
 0x6ee   :  { %v591_v29 = vpop.xlane.xlu1 %590 }
 0x6ef   :  { %2708 = vrcp.f32 %v591_v29 }
 0x6f0   :  { %v604_v30 = vpop.permute.xlu0 %603 }
 0x6f1   :  { %2500 = vmatpush3.bf16.msra.mxu0 %v604_v30 }
 0x6f2   :  { %2511 = vmatprep.subr.bf16.mxu0 %v2781_v4  ;;  %v703_v43 = vpop.permute.xlu1 %702 }
 0x6f3   :  { %v708_v44 = vsel %vm173_vm2, %v703_v43, 0 }
 0x6f6   :  { %v701_v45 = vpop.permute.xlu1 %700 }
 0x6f7   :  { %v2707_v31 = vpop.eup %2706 }
 0x6f8   :  { %v594_v32 = vmul.f32 %v2707_v31, %v588_v28 }
 0x6f9   :  { %v2709_v34 = vpop.eup %2708 }
 0x6fa   :  { %v596_v36 = vsub.f32 2.0, %v594_v32  ;;  %v595_v37 = vmul.f32 %v2709_v34, %v591_v29 }
 0x6fc   :  { %v598_v38 = vmul.f32 %v2707_v31, %v596_v36  ;;  %v597_v39 = vsub.f32 2.0, %v595_v37 }
 0x6fe   :  { %v599_v40 = vmul.f32 %v2709_v34, %v597_v39  ;;  %v600_v41 = vmul.f32 %v2703_v22, %v598_v38 }
 0x700   :  { %v601_v42 = vmul.f32 %v2705_v24, %v599_v40 }
 0x702   :  { %v602_v27 = vpack.c.bf16 %v601_v42, %v600_v41  ;;  %v2301_v41 = vld [vmem:[%s3400_s10] ss:$0 sm:$0xff] }
 0x704   :  { %2502 = vmatmul.mubr.msk.bf16.vlgmr.msra.gmra.mrb[16].mxu0 %vm221_vm3, %v602_v27 }
 0x705   :  { %2512 = vmatpush3.bf16.xpose.msra.mxu0 %v708_v44  ;;  %2513 = vmatprep.mubr.msk.bf16.mxu0 %vm2782_vm0, %v2781_v4 }
 0x706   :  { %2523 = vmatprep.subr.bf16.mxu0 %v2781_v4 }
 0x70c   :  { %2514 = vmatmul.mubr.msk.bf16.vlgmr.msra.gmra.mrb[20].mxu0 %vm173_vm2, %v701_v45 }
 0x70d   :  { %2525 = vmatprep.mubr.msk.bf16.mxu0 %vm2782_vm0, %v2781_v4 }
 0x7d7   :  { %v643_v48 = vpop.f32.mrb[16].mxu0 }
 0x7d8   :  { %v2503_v49 = vpop.f32.mrb[17].mxu0 }
 0x7d9   :  { %v646_v50 = vpop.f32.mrb[18].mxu0 }
 0x7da   :  { %v650_v51 = vpack.c.bf16 %v646_v50, %v643_v48  ;;  %v2504_v52 = vpop.f32.mrb[19].mxu0 }
 0x7dc   :  { %2508 = vmatmul.mubr.msk.bf16.vlgmr.msra.gmra.mrb[16].mxu1 %vm173_vm2, %v650_v51 }
 0x7dd   :  { %2519 = vmatprep.mubr.msk.bf16.mxu1 %vm2782_vm0, %v2781_v4 }
 0x7df   :  { %v744_v53 = vpop.f32.mrb[20].mxu0 }
 0x7e0   :  { %v745_v54 = vadd.f32 %v744_v53, %v2972_v33  ;;  %v2515_v55 = vpop.f32.mrb[21].mxu0 }
 0x7e1   :  { %v747_v56 = vpop.f32.mrb[22].mxu0 }
 0x7e2   :  { %v748_v57 = vadd.f32 %v747_v56, %v2977_v35  ;;  %v2516_v58 = vpop.f32.mrb[23].mxu0  ;;  %v751_v59 = vsel %vm221_vm3, %v745_v54, -inf }
 0x7e3   :  { %752 = vmax.xlane.f32.xlu0 %v751_v59 }
 0x7e4   :  { %v754_v60 = vsel %vm221_vm3, %v748_v57, -inf }
 0x7e5   :  { %755 = vmax.xlane.f32.xlu1 %v754_v60  ;;  %v2672_v60 = vld [vmem:[%s3401_s13] sm:$0xff]  }
 0x7f6   :  { %780 = vrot.lane.b32.xlu1 %v2948_v26, %s3421_s7  ;;  %v169_v26 = vld [vmem:[%s3399_s9 + $0xc] sm:$0xf]  ;;  %s3442_s7 = smov 48  }
 0x7f7   :  { %v832_v11 = vsel %vm431_vm4, %v169_v26, 0 }
 0x7f8   :  { %2524 = vmatpush3.bf16.msra.mxu0 %v832_v11 }
 0x7f9   :  { %2537 = vmatprep.subr.bf16.mxu0 %v2781_v4 }
 0x870   :  { %v753_v61 = vpop.xlane.xlu0 %752 }
 0x871   :  { %v757_v62 = vsub.f32 %v745_v54, %v753_v61  ;;  %v2673_v61 = vld [vmem:[%s3401_s13 + $0x8] sm:$0xff]  }
 0x872   :  { %v756_v63 = vpop.xlane.xlu1 %755 }
 0x873   :  { %v759_v1 = vmul.f32 1.442695, %v757_v62  ;;  %v758_v2 = vsub.f32 %v748_v57, %v756_v63 }
 0x875   :  { %2710 = vpow2.f32 %v759_v1  ;;  %v761_v5 = vmul.f32 1.442695, %v758_v2 }
 0x876   :  { %v781_v6 = vpop.permute.xlu1 %780 }
 0x877   :  { %2712 = vpow2.f32 %v761_v5  ;;  %2518 = vmatpush3.bf16.msra.mxu1 %v781_v6 }
 0x878   :  { %2529 = vmatprep.subr.bf16.mxu1 %v2781_v4 }
 0x87f   :  { %v2711_v7 = vpop.eup %2710 }
 0x880   :  { %v763_v8 = vsel %vm221_vm3, %v2711_v7, 0.0 }
 0x881   :  { %v2713_v9 = vpop.eup %2712  ;;  %764 = vadd.xlane.f32.xlu0 %v763_v8 }
 0x882   :  { %v766_v10 = vsel %vm221_vm3, %v2713_v9, 0.0 }
 0x885   :  { %767 = vadd.xlane.f32.xlu0 %v766_v10 }
 0x8af   :  { %v691_v12 = vpop.f32.mrb[16].mxu1 }
 0x8b0   :  { %v698_v13 = vadd.f32 %v691_v12, %v3028_v0  ;;  %v2509_v16 = vpop.f32.mrb[17].mxu1  ;;  %v2303_v12 = vld [vmem:[%s3403_s12] ss:$0 sm:$0xff] }
 0x8b1   :  { %v694_v17 = vpop.f32.mrb[18].mxu1 }
 0x8b2   :  { %v699_v18 = vadd.f32 %v694_v17, %v3030_v3  ;;  %v2510_v19 = vpop.f32.mrb[19].mxu1 }
 0x8b3   :  { %v2674_v19 = vld [vmem:[%s3404_s15] sm:$0xff]  }
 0x90e   :  { %v765_v20 = vpop.xlane.xlu0 %764 }
 0x90f   :  { %2714 = vrcp.f32 %v765_v20 }
 0x912   :  { %v768_v21 = vpop.xlane.xlu0 %767 }
 0x913   :  { %2716 = vrcp.f32 %v768_v21 }
 0x919   :  { %v2715_v22 = vpop.eup %2714 }
 0x91a   :  { %v771_v23 = vmul.f32 %v2715_v22, %v765_v20  ;;  %v2675_v20 = vld [vmem:[%s3404_s15 + $0x8] sm:$0xff]  }
 0x91c   :  { %v773_v24 = vsub.f32 2.0, %v771_v23  ;;  %v2304_v23 = vld [vmem:[%s3405_s14] ss:$0 sm:$0xff] }
 0x91d   :  { %v2717_v25 = vpop.eup %2716 }
 0x91e   :  { %v772_v28 = vmul.f32 %v2717_v25, %v768_v21  ;;  %v775_v29 = vmul.f32 %v2715_v22, %v773_v24  ;;  %v2676_v21 = vld [vmem:[%s3404_s15 + $0x10] sm:$0xff]   ;;  %v2677_v22 = vld [vmem:[%s3404_s15 + $0x18] sm:$0xff]  }
 0x920   :  { %v774_v30 = vsub.f32 2.0, %v772_v28  ;;  %v777_v32 = vmul.f32 %v2711_v7, %v775_v29 }
 0x922   :  { %v776_v31 = vmul.f32 %v2717_v25, %v774_v30 }
 0x924   :  { %v778_v34 = vmul.f32 %v2713_v9, %v776_v31  ;;  %v2302_v9 = vld [vmem:[%s3402_s11] ss:$0 sm:$0xff] }
 0x926   :  { %v779_v0 = vpack.c.bf16 %v778_v34, %v777_v32 }
 0x928   :  { %2520 = vmatmul.mubr.msk.bf16.vlgmr.msra.gmra.mrb[20].mxu1 %vm221_vm3, %v779_v0 }
 0x929   :  { %2533 = vmatprep.mubr.msk.bf16.mxu1 %vm2782_vm0, %v2781_v4  ;;  %2530 = vmatpush3.bf16.msra.mxu1 %v2672_v60 }
 0x92a   :  { %2531 = vmatprep.subr.bf16.mxu1 %v2781_v4 }
 0x92d   :  { %2532 = vmatpush3.bf16.msra.mxu1 %v2673_v61 }
 0x92e   :  { %2549 = vmatprep.subr.bf16.mxu1 %v2781_v4 }
 0x9fb   :  { %v820_v3 = vpop.f32.mrb[20].mxu1 }
 0x9fc   :  { %v2521_v36 = vpop.f32.mrb[21].mxu1 }
 0x9fd   :  { %v823_v37 = vpop.f32.mrb[22].mxu1 }
 0x9fe   :  { %v827_v38 = vpack.c.bf16 %v823_v37, %v820_v3  ;;  %v2522_v39 = vpop.f32.mrb[23].mxu1 }
 0xa00   :  { %2526 = vmatmul.mubr.msk.bf16.vlgmr.msra.gmra.mrb[24].mxu0 %vm173_vm2, %v827_v38 }
 0xa01   :  { %2545 = vmatprep.mubr.msk.bf16.mxu0 %vm2782_vm0, %v2781_v4  ;;  %2538 = vmatpush3.bf16.msra.mxu0 %v2674_v19  ;;  %v2316_v19 = vld [vmem:[%s3407_s5 + $0x1] ss:$0 sm:$0xff]  ;;  %s3439_s5 = smov 80  }
 0xa02   :  { %2539 = vmatprep.subr.bf16.mxu0 %v2781_v4 }
 0xa05   :  { %2540 = vmatpush3.bf16.msra.mxu0 %v2675_v20 }
 0xa06   :  { %2541 = vmatprep.subr.bf16.mxu0 %v2781_v4 }
 0xa09   :  { %2542 = vmatpush3.bf16.msra.mxu0 %v2676_v21 }
 0xa0a   :  { %2543 = vmatprep.subr.bf16.mxu0 %v2781_v4 }
 0xa0d   :  { %2544 = vmatpush3.bf16.msra.mxu0 %v2677_v22 }
 0xa0e   :  { %2563 = vmatprep.subr.bf16.mxu0 %v2781_v4 }
 0xad3   :  { %v868_v40 = vpop.f32.mrb[24].mxu0 }
 0xad4   :  { %v875_v42 = vadd.f32 %v868_v40, %v698_v13  ;;  %v2527_v43 = vpop.f32.mrb[25].mxu0 }
 0xad5   :  { %v871_v27 = vpop.f32.mrb[26].mxu0 }
 0xad6   :  { %v884_v44 = vadd.f32 %v2301_v41, %v875_v42  ;;  %v876_v45 = vadd.f32 %v871_v27, %v699_v18  ;;  %v2528_v46 = vpop.f32.mrb[27].mxu0 }
 0xad8   :  { %v3087_v47 = vadd.f32 %v884_v44, %v2936_v14  ;;  %v885_v48 = vadd.f32 %v2301_v41, %v876_v45 }
 0xada   :  { %v3090_v49 = vadd.f32 %v885_v48, %v2938_v15  ;;  %v890_v50 = vsel %vm117_vm1, %v3087_v47, 0.0 }
 0xadb   :  { %891 = vadd.xlane.f32.xlu0 %v890_v50 }
 0xadc   :  { %v893_v51 = vsel %vm117_vm1, %v3090_v49, 0.0 }
 0xadf   :  { %894 = vadd.xlane.f32.xlu0 %v893_v51 }
 0xb68   :  { %v892_v52 = vpop.xlane.xlu0 %891 }
 0xb69   :  { %v897_v53 = vmul.f32 0.03125, %v892_v52  ;;  %v2308_v52 = vld [vmem:[%s3406_s16] ss:$0 sm:$0xff] }
 0xb6b   :  { %v899_v54 = vsub.f32 %v3087_v47, %v897_v53 }
 0xb6c   :  { %v895_v55 = vpop.xlane.xlu0 %894 }
 0xb6d   :  { %v898_v56 = vmul.f32 0.03125, %v895_v55  ;;  %v901_v14 = vmul.f32 %v899_v54, %v899_v54 }
 0xb6f   :  { %v900_v57 = vsub.f32 %v3090_v49, %v898_v56  ;;  %v903_v15 = vsel %vm117_vm1, %v901_v14, 0.0 }
 0xb70   :  { %904 = vadd.xlane.f32.xlu0 %v903_v15 }
 0xb71   :  { %v902_v58 = vmul.f32 %v900_v57, %v900_v57 }
 0xb73   :  { %v906_v59 = vsel %vm117_vm1, %v902_v58, 0.0 }
 0xb74   :  { %907 = vadd.xlane.f32.xlu0 %v906_v59 }
 0xbfd   :  { %v905_v62 = vpop.xlane.xlu0 %904 }
 0xbfe   :  { %v909_v63 = vmul.f32 0.03125, %v905_v62 }
 0xc00   :  { %v911_v1 = vadd.f32 1e-06, %v909_v63 }
 0xc01   :  { %v908_v2 = vpop.xlane.xlu0 %907 }
 0xc02   :  { %2718 = vrsqrt.f32 %v911_v1  ;;  %v910_v5 = vmul.f32 0.03125, %v908_v2 }
 0xc04   :  { %v912_v6 = vadd.f32 1e-06, %v910_v5 }
 0xc06   :  { %2720 = vrsqrt.f32 %v912_v6 }
 0xc0c   :  { %v2719_v7 = vpop.eup %2718 }
 0xc0d   :  { %v915_v8 = vmul.f32 %v2719_v7, %v899_v54 }
 0xc0f   :  { %v923_v26 = vmul.f32 %v2302_v9, %v915_v8  ;;  %v2678_v8 = vld [vmem:[%s3434_s1 + $0x10] sm:$0xff]  }
 0xc10   :  { %v2721_v10 = vpop.eup %2720 }
 0xc11   :  { %v916_v11 = vmul.f32 %v2721_v10, %v900_v57  ;;  %v931_v16 = vadd.f32 %v2303_v12, %v923_v26 }
 0xc13   :  { %v924_v13 = vmul.f32 %v2302_v9, %v916_v11  ;;  %v2679_v9 = vld [vmem:[%s3434_s1 + $0x18] sm:$0xff]  }
 0xc15   :  { %v932_v17 = vadd.f32 %v2303_v12, %v924_v13 }
 0xc17   :  { %v933_v18 = vpack.c.bf16 %v932_v17, %v931_v16 }
 0xc19   :  { %2534 = vmatmul.mubr.msk.bf16.vlgmr.msra.gmra.mrb[24].mxu1 %vm117_vm1, %v933_v18 }
 0xc1a   :  { %2553 = vmatprep.mubr.msk.bf16.mxu1 %vm2782_vm0, %v2781_v4  ;;  %2550 = vmatpush3.bf16.msra.mxu1 %v2678_v8 }
 0xc1b   :  { %2551 = vmatprep.subr.bf16.mxu1 %v2781_v4 }
 0xc1e   :  { %2552 = vmatpush3.bf16.msra.mxu1 %v2679_v9 }
 0xc1f   :  { %2557 = vmatprep.subr.bf16.mxu1 %v2781_v4 }
 0xcec   :  { %v994_v24 = vpop.f32.mrb[24].mxu1 }
 0xced   :  { %v995_v25 = vadd.f32 %v2304_v23, %v994_v24  ;;  %v2535_v28 = vpop.f32.mrb[25].mxu1 }
 0xcee   :  { %v997_v29 = vpop.f32.mrb[26].mxu1 }
 0xcef   :  { %v1003_v30 = vmul.f32 %v995_v25, %v995_v25  ;;  %v998_v31 = vadd.f32 %v2304_v23, %v997_v29  ;;  %v2536_v32 = vpop.f32.mrb[27].mxu1  ;;  %v1001_v44 = vmul.f32 0.5, %v995_v25  ;;  %v2317_v23 = vld [vmem:[%s3408_s6 + $0x1] ss:$0 sm:$0xff]  ;;  %s3440_s6 = smov 112  }
 0xcf1   :  { %v1005_v34 = vmul.f32 %v1003_v30, %v995_v25  ;;  %v1004_v0 = vmul.f32 %v998_v31, %v998_v31  ;;  %v1002_v45 = vmul.f32 0.5, %v998_v31  ;;  %v2323_v30 = vld [vmem:[%s3437_s8 + $0x1] ss:$0 sm:$0xff] }
 0xcf3   :  { %v1007_v3 = vmul.f32 0.044715, %v1005_v34  ;;  %v1006_v36 = vmul.f32 %v1004_v0, %v998_v31 }
 0xcf5   :  { %v1009_v37 = vadd.f32 %v1007_v3, %v995_v25  ;;  %v1008_v38 = vmul.f32 0.044715, %v1006_v36 }
 0xcf7   :  { %v1011_v39 = vmul.f32 0.7978846, %v1009_v37  ;;  %v1010_v40 = vadd.f32 %v1008_v38, %v998_v31 }
 0xcf9   :  { %2722 = vtanh.f32 %v1011_v39  ;;  %v1012_v41 = vmul.f32 0.7978846, %v1010_v40 }
 0xcfb   :  { %2724 = vtanh.f32 %v1012_v41 }
 0xd03   :  { %v2723_v42 = vpop.eup %2722 }
 0xd04   :  { %v1015_v43 = vadd.f32 1.0, %v2723_v42 }
 0xd05   :  { %v2725_v27 = vpop.eup %2724 }
 0xd06   :  { %v1016_v46 = vadd.f32 1.0, %v2725_v27  ;;  %v1017_v48 = vmul.f32 %v1015_v43, %v1001_v44 }
 0xd08   :  { %v1018_v50 = vmul.f32 %v1016_v46, %v1002_v45 }
 0xd0a   :  { %v1019_v51 = vpack.c.bf16 %v1018_v50, %v1017_v48 }
 0xd0c   :  { %2546 = vmatmul.mubr.msk.bf16.vlgmr.msra.gmra.mrb[28].mxu0 %vm1059_vm5, %v1019_v51 }
 0xd0d   :  { %2565 = vmatprep.mubr.msk.bf16.mxu0 %vm2782_vm0, %v2781_v4 }
 0xddf   :  { %v1097_v53 = vpop.f32.mrb[28].mxu0 }
 0xde0   :  { %v1098_v54 = vadd.f32 %v2308_v52, %v1097_v53  ;;  %v2547_v55 = vpop.f32.mrb[29].mxu0 }
 0xde1   :  { %v1100_v56 = vpop.f32.mrb[30].mxu0 }
 0xde2   :  { %v3143_v14 = vadd.f32 %v1098_v54, %v3087_v47  ;;  %v1101_v57 = vadd.f32 %v2308_v52, %v1100_v56  ;;  %v2548_v15 = vpop.f32.mrb[31].mxu0 }
 0xde4   :  { %v3146_v58 = vadd.f32 %v1101_v57, %v3090_v49  ;;  %v1110_v59 = vsel %vm117_vm1, %v3143_v14, 0.0 }
 0xde5   :  { %1111 = vadd.xlane.f32.xlu1 %v1110_v59 }
 0xde6   :  { %v1113_v60 = vsel %vm117_vm1, %v3146_v58, 0.0 }
 0xde7   :  { %1114 = vadd.xlane.f32.xlu0 %v1113_v60 }
 0xe72   :  { %v1112_v61 = vpop.xlane.xlu1 %1111 }
 0xe73   :  { %v1116_v62 = vmul.f32 0.03125, %v1112_v61 }
 0xe74   :  { %v1115_v63 = vpop.xlane.xlu0 %1114 }
 0xe75   :  { %v1118_v1 = vsub.f32 %v3143_v14, %v1116_v62  ;;  %v1117_v47 = vmul.f32 0.03125, %v1115_v63 }
 0xe77   :  { %v1119_v2 = vsub.f32 %v3146_v58, %v1117_v47  ;;  %v1120_v5 = vmul.f32 %v1118_v1, %v1118_v1 }
 0xe79   :  { %v1122_v49 = vsel %vm117_vm1, %v1120_v5, 0.0  ;;  %v1121_v6 = vmul.f32 %v1119_v2, %v1119_v2 }
 0xe7a   :  { %1123 = vadd.xlane.f32.xlu0 %v1122_v49 }
 0xe7b   :  { %v1125_v7 = vsel %vm117_vm1, %v1121_v6, 0.0 }
 0xe7e   :  { %1126 = vadd.xlane.f32.xlu0 %v1125_v7 }
 0xf07   :  { %v1124_v10 = vpop.xlane.xlu0 %1123 }
 0xf08   :  { %v1128_v26 = vmul.f32 0.03125, %v1124_v10 }
 0xf0a   :  { %v1130_v11 = vadd.f32 1e-06, %v1128_v26 }
 0xf0b   :  { %v1127_v12 = vpop.xlane.xlu0 %1126 }
 0xf0c   :  { %2726 = vrsqrt.f32 %v1130_v11  ;;  %v1129_v13 = vmul.f32 0.03125, %v1127_v12 }
 0xf0e   :  { %v1131_v16 = vadd.f32 1e-06, %v1129_v13 }
 0xf10   :  { %2728 = vrsqrt.f32 %v1131_v16 }
 0xf16   :  { %v2727_v17 = vpop.eup %2726 }
 0xf17   :  { %v1134_v18 = vmul.f32 %v2727_v17, %v1118_v1 }
 0xf19   :  { %v1142_v21 = vmul.f32 %v2316_v19, %v1134_v18 }
 0xf1a   :  { %v2729_v20 = vpop.eup %2728 }
 0xf1b   :  { %v1135_v22 = vmul.f32 %v2729_v20, %v1119_v2  ;;  %v1150_v25 = vadd.f32 %v2317_v23, %v1142_v21 }
 0xf1d   :  { %v1143_v24 = vmul.f32 %v2316_v19, %v1135_v22 }
 0xf1f   :  { %v1151_v28 = vadd.f32 %v2317_v23, %v1143_v24 }
 0xf21   :  { %v1152_v29 = vpack.c.bf16 %v1151_v28, %v1150_v25 }
 0xf23   :  { %2554 = vmatmul.mubr.msk.bf16.vlgmr.msra.gmra.mrb[28].mxu1 %vm117_vm1, %v1152_v29 }
 0xf24   :  { %2559 = vmatprep.mubr.msk.bf16.mxu1 %vm2782_vm0, %v2781_v4 }
 0xff6   :  { %v1215_v31 = vpop.f32.mrb[28].mxu1 }
 0xff7   :  { %v1216_v32 = vadd.f32 %v2323_v30, %v1215_v31  ;;  %v2555_v34 = vpop.f32.mrb[29].mxu1 }
 0xff8   :  { %v1218_v0 = vpop.f32.mrb[30].mxu1 }
 0xff9   :  { %v1219_v3 = vadd.f32 %v2323_v30, %v1218_v0  ;;  %v2556_v36 = vpop.f32.mrb[31].mxu1  ;;  %v1222_v37 = vmul.f32 0.35355338, %v1216_v32 }
 0xffb   :  { %v1223_v38 = vmul.f32 0.35355338, %v1219_v3  ;;  %v3176_v39 = vpack.c.bf16 %v1219_v3, %v1216_v32 }
 0xffd   :  { %v3178_v40 = vpack.c.bf16 %v1223_v38, %v1222_v37  ;;  %1232 = vrot.lane.b32.xlu0 %v3176_v39, %s2783_s30 }
 0xfff   :  { %1359 = vrot.lane.b32.xlu1 %v3178_v40, %s2784_s3 }
0x1001   :  { %1361 = vrot.lane.b32.xlu0 %v3176_v39, %s2785_s22 }
0x106f   :  { %v1233_v41 = vpop.permute.xlu0 %1232 }
0x1070   :  { %v1238_v42 = vsel %vm173_vm2, %v1233_v41, 0 }
0x1071   :  { %2558 = vmatpush3.bf16.xpose.msra.mxu1 %v1238_v42  ;;  %v1360_v44 = vpop.permute.xlu1 %1359 }
0x1072   :  { %2569 = vmatprep.subr.bf16.mxu1 %v2781_v4 }
0x1073   :  { %v1362_v43 = vpop.permute.xlu0 %1361 }
0x1074   :  { %v1367_v27 = vsel %vm173_vm2, %v1362_v43, 0 }
0x1078   :  { %2560 = vmatmul.mubr.msk.bf16.vlgmr.msra.gmra.mrb[32].mxu1 %vm173_vm2, %v3178_v40 }
0x1079   :  { %2570 = vmatpush3.bf16.xpose.msra.mxu1 %v1367_v27  ;;  %2571 = vmatprep.mubr.msk.bf16.mxu1 %vm2782_vm0, %v2781_v4 }
0x107a   :  { %2581 = vmatprep.subr.bf16.mxu1 %v2781_v4 }
0x1080   :  { %2572 = vmatmul.mubr.msk.bf16.vlgmr.msra.gmra.mrb[36].mxu1 %vm173_vm2, %v1360_v44 }
0x1081   :  { %2583 = vmatprep.mubr.msk.bf16.mxu1 %vm2782_vm0, %v2781_v4 }
0x114b   :  { %v1274_v45 = vpop.f32.mrb[32].mxu1 }
0x114c   :  { %v1275_v46 = vadd.f32 %v1274_v45, %v2972_v33  ;;  %v2561_v48 = vpop.f32.mrb[33].mxu1 }
0x114d   :  { %v1277_v50 = vpop.f32.mrb[34].mxu1 }
0x114e   :  { %v1278_v51 = vadd.f32 %v1277_v50, %v2977_v35  ;;  %v2562_v52 = vpop.f32.mrb[35].mxu1  ;;  %v1281_v53 = vsel %vm221_vm3, %v1275_v46, -inf }
0x114f   :  { %1282 = vmax.xlane.f32.xlu0 %v1281_v53  ;;  %v2327_v52 = vld [vmem:[%s3399_s9 + $0x10] sm:$0xf] }
0x1150   :  { %v1284_v54 = vsel %vm221_vm3, %v1278_v51, -inf  ;;  %v1538_v53 = vsel %vm431_vm4, %v2327_v52, 0 }
0x1151   :  { %1285 = vmax.xlane.f32.xlu1 %v1284_v54  ;;  %v2328_v54 = vld [vmem:[%s3399_s9 + $0x14] sm:$0xf] }
0x1153   :  { %v1403_v55 = vpop.f32.mrb[36].mxu1 }
0x1154   :  { %v1404_v56 = vadd.f32 %v1403_v55, %v2972_v33  ;;  %v2573_v57 = vpop.f32.mrb[37].mxu1  ;;  %v1491_v55 = vsel %vm431_vm4, %v2328_v54, 0 }
0x1155   :  { %v1406_v15 = vpop.f32.mrb[38].mxu1  ;;  %2582 = vmatpush3.bf16.msra.mxu1 %v1491_v55 }
0x1156   :  { %v1407_v59 = vadd.f32 %v1406_v15, %v2977_v35  ;;  %v2574_v60 = vpop.f32.mrb[39].mxu1  ;;  %v1410_v61 = vsel %vm221_vm3, %v1404_v56, -inf  ;;  %2593 = vmatprep.subr.bf16.mxu1 %v2781_v4 }
0x1157   :  { %1411 = vmax.xlane.f32.xlu0 %v1410_v61 }
0x1158   :  { %v1413_v62 = vsel %vm221_vm3, %v1407_v59, -inf }
0x115b   :  { %1414 = vmax.xlane.f32.xlu0 %v1413_v62 }
0x11dc   :  { %v1283_v63 = vpop.xlane.xlu0 %1282 }
0x11dd   :  { %v1287_v1 = vsub.f32 %v1275_v46, %v1283_v63 }
0x11de   :  { %v1286_v47 = vpop.xlane.xlu1 %1285 }
0x11df   :  { %v1289_v2 = vmul.f32 1.442695, %v1287_v1  ;;  %v1288_v5 = vsub.f32 %v1278_v51, %v1286_v47 }
0x11e1   :  { %2730 = vpow2.f32 %v1289_v2  ;;  %v1291_v49 = vmul.f32 1.442695, %v1288_v5 }
0x11e3   :  { %2732 = vpow2.f32 %v1291_v49 }
0x11e4   :  { %v1412_v33 = vpop.xlane.xlu0 %1411 }
0x11e5   :  { %v1416_v6 = vsub.f32 %v1404_v56, %v1412_v33 }
0x11e7   :  { %v1418_v7 = vmul.f32 1.442695, %v1416_v6 }
0x11e8   :  { %v1415_v8 = vpop.xlane.xlu0 %1414 }
0x11e9   :  { %2734 = vpow2.f32 %v1418_v7  ;;  %v1417_v35 = vsub.f32 %v1407_v59, %v1415_v8 }
0x11eb   :  { %v2731_v9 = vpop.eup %2730  ;;  %v1420_v10 = vmul.f32 1.442695, %v1417_v35 }
0x11ec   :  { %v1293_v26 = vsel %vm221_vm3, %v2731_v9, 0.0 }
0x11ed   :  { %v2733_v11 = vpop.eup %2732  ;;  %2736 = vpow2.f32 %v1420_v10  ;;  %1294 = vadd.xlane.f32.xlu0 %v1293_v26 }
0x11ee   :  { %v1296_v12 = vsel %vm221_vm3, %v2733_v11, 0.0 }
0x11f1   :  { %1297 = vadd.xlane.f32.xlu0 %v1296_v12 }
0x11f3   :  { %v2735_v13 = vpop.eup %2734 }
0x11f4   :  { %v1422_v16 = vsel %vm221_vm3, %v2735_v13, 0.0 }
0x11f5   :  { %1423 = vadd.xlane.f32.xlu0 %v1422_v16  ;;  %v3253_v16 = vld [vmem:[%s3438_s24] sm:$0xff] }
0x11f7   :  { %v2737_v17 = vpop.eup %2736 }
0x11f8   :  { %v1425_v18 = vsel %vm221_vm3, %v2737_v17, 0.0 }
0x11f9   :  { %1426 = vadd.xlane.f32.xlu1 %v1425_v18 }
0x120a   :  { %1439 = vrot.lane.b32.xlu1 %v3176_v39, %s2786_s26 }
0x120b   :  { %1310 = vrot.lane.b32.xlu0 %v3176_v39, %s2787_s27 }
0x120e   :  { %1583 = vrot.lane.b32.xlu1 %v3176_v39, %s3439_s5 }
0x120f   :  { %1581 = vrot.lane.b32.xlu0 %v3178_v40, %s3440_s6 }
0x127a   :  { %v1295_v19 = vpop.xlane.xlu0 %1294 }
0x127b   :  { %2738 = vrcp.f32 %v1295_v19 }
0x127e   :  { %v1298_v20 = vpop.xlane.xlu0 %1297 }
0x127f   :  { %2740 = vrcp.f32 %v1298_v20 }
0x1282   :  { %v1424_v21 = vpop.xlane.xlu0 %1423 }
0x1283   :  { %2742 = vrcp.f32 %v1424_v21 }
0x1285   :  { %v2739_v22 = vpop.eup %2738 }
0x1286   :  { %v1301_v23 = vmul.f32 %v2739_v22, %v1295_v19  ;;  %v1427_v24 = vpop.xlane.xlu1 %1426  ;;  %v1311_v25 = vpop.permute.xlu0 %1310 }
0x1287   :  { %2744 = vrcp.f32 %v1427_v24  ;;  %2564 = vmatpush3.bf16.msra.mxu0 %v1311_v25 }
0x1288   :  { %v1303_v28 = vsub.f32 2.0, %v1301_v23  ;;  %2575 = vmatprep.subr.bf16.mxu0 %v2781_v4 }
0x1289   :  { %v2741_v29 = vpop.eup %2740 }
0x128a   :  { %v1302_v30 = vmul.f32 %v2741_v29, %v1298_v20  ;;  %v1305_v31 = vmul.f32 %v2739_v22, %v1303_v28  ;;  %v1440_v45 = vpop.permute.xlu1 %1439  ;;  %v1582_v49 = vpop.permute.xlu0 %1581  ;;  %v3259_v20 = vld [vmem:[%s3438_s24 + $0x8] sm:$0xff]  ;;  %s3441_s24 = smov 72  }
0x128c   :  { %v1304_v32 = vsub.f32 2.0, %v1302_v30  ;;  %v1307_v36 = vmul.f32 %v2731_v9, %v1305_v31 }
0x128d   :  { %v2743_v34 = vpop.eup %2742 }
0x128e   :  { %v1306_v0 = vmul.f32 %v2741_v29, %v1304_v32  ;;  %v1430_v3 = vmul.f32 %v2743_v34, %v1424_v21  ;;  %v1584_v63 = vpop.permute.xlu1 %1583 }
0x128f   :  { %v1589_v5 = vsel %vm173_vm2, %v1584_v63, 0 }
0x1290   :  { %v1308_v37 = vmul.f32 %v2733_v11, %v1306_v0  ;;  %v1432_v38 = vsub.f32 2.0, %v1430_v3 }
0x1291   :  { %v2745_v41 = vpop.eup %2744 }
0x1292   :  { %v1309_v42 = vpack.c.bf16 %v1308_v37, %v1307_v36  ;;  %v1431_v43 = vmul.f32 %v2745_v41, %v1427_v24  ;;  %v1434_v27 = vmul.f32 %v2743_v34, %v1432_v38 }
0x1294   :  { %v1433_v44 = vsub.f32 2.0, %v1431_v43  ;;  %2566 = vmatmul.mubr.msk.bf16.vlgmr.msra.gmra.mrb[32].mxu0 %vm221_vm3, %v1309_v42  ;;  %v1436_v48 = vmul.f32 %v2735_v13, %v1434_v27 }
0x1295   :  { %2576 = vmatpush3.bf16.msra.mxu0 %v1440_v45  ;;  %2577 = vmatprep.mubr.msk.bf16.mxu0 %vm2782_vm0, %v2781_v4 }
0x1296   :  { %v1435_v46 = vmul.f32 %v2745_v41, %v1433_v44  ;;  %2587 = vmatprep.subr.bf16.mxu0 %v2781_v4 }
0x1298   :  { %v1437_v50 = vmul.f32 %v2737_v17, %v1435_v46 }
0x129a   :  { %v1438_v51 = vpack.c.bf16 %v1437_v50, %v1436_v48 }
0x129c   :  { %2578 = vmatmul.mubr.msk.bf16.vlgmr.msra.gmra.mrb[36].mxu0 %vm221_vm3, %v1438_v51 }
0x129d   :  { %2589 = vmatprep.mubr.msk.bf16.mxu0 %vm2782_vm0, %v2781_v4  ;;  %2588 = vmatpush3.bf16.msra.mxu0 %v1538_v53 }
0x129e   :  { %2599 = vmatprep.subr.bf16.mxu0 %v2781_v4 }
0x1367   :  { %v1350_v56 = vpop.f32.mrb[32].mxu0 }
0x1368   :  { %v2567_v57 = vpop.f32.mrb[33].mxu0 }
0x1369   :  { %v1353_v15 = vpop.f32.mrb[34].mxu0 }
0x136a   :  { %v1357_v59 = vpack.c.bf16 %v1353_v15, %v1350_v56  ;;  %v2568_v60 = vpop.f32.mrb[35].mxu0  ;;  %v2329_v56 = vld [vmem:[%s3399_s9 + $0x18] sm:$0xf] }
0x136b   :  { %v1713_v57 = vsel %vm431_vm4, %v2329_v56, 0 }
0x136c   :  { %2590 = vmatmul.mubr.msk.bf16.vlgmr.msra.gmra.mrb[40].mxu0 %vm173_vm2, %v1357_v59 }
0x136d   :  { %2601 = vmatprep.mubr.msk.bf16.mxu0 %vm2782_vm0, %v2781_v4 }
0x136f   :  { %v1479_v61 = vpop.f32.mrb[36].mxu0 }
0x1370   :  { %v2579_v62 = vpop.f32.mrb[37].mxu0 }
0x1371   :  { %v1482_v1 = vpop.f32.mrb[38].mxu0 }
0x1372   :  { %v1486_v47 = vpack.c.bf16 %v1482_v1, %v1479_v61  ;;  %v2580_v2 = vpop.f32.mrb[39].mxu0 }
0x1374   :  { %2584 = vmatmul.mubr.msk.bf16.vlgmr.msra.gmra.mrb[40].mxu1 %vm173_vm2, %v1486_v47 }
0x1375   :  { %2594 = vmatpush3.bf16.xpose.msra.mxu1 %v1589_v5  ;;  %2595 = vmatprep.mubr.msk.bf16.mxu1 %vm2782_vm0, %v2781_v4 }
0x1376   :  { %2605 = vmatprep.subr.bf16.mxu1 %v2781_v4 }
0x137c   :  { %2596 = vmatmul.mubr.msk.bf16.vlgmr.msra.gmra.mrb[44].mxu1 %vm173_vm2, %v1582_v49 }
0x137d   :  { %2607 = vmatprep.mubr.msk.bf16.mxu1 %vm2782_vm0, %v2781_v4  ;;  %2606 = vmatpush3.bf16.msra.mxu1 %v1713_v57 }
0x137e   :  { %2617 = vmatprep.subr.bf16.mxu1 %v2781_v4 }
0x143f   :  { %v1574_v33 = vpop.f32.mrb[40].mxu0 }
0x1440   :  { %v2591_v6 = vpop.f32.mrb[41].mxu0 }
0x1441   :  { %v1577_v7 = vpop.f32.mrb[42].mxu0 }
0x1442   :  { %v2592_v8 = vpop.f32.mrb[43].mxu0 }
0x1447   :  { %v1527_v35 = vpop.f32.mrb[40].mxu1 }
0x1448   :  { %v3246_v9 = vadd.f32 %v1574_v33, %v1527_v35  ;;  %v2585_v10 = vpop.f32.mrb[41].mxu1 }
0x1449   :  { %v1530_v26 = vpop.f32.mrb[42].mxu1 }
0x144a   :  { %v3248_v11 = vadd.f32 %v1577_v7, %v1530_v26  ;;  %v2586_v12 = vpop.f32.mrb[43].mxu1 }
0x144f   :  { %v1625_v13 = vpop.f32.mrb[44].mxu1 }
0x1450   :  { %v1626_v17 = vadd.f32 %v3253_v16, %v1625_v13  ;;  %v2597_v18 = vpop.f32.mrb[45].mxu1 }
0x1451   :  { %v1628_v19 = vpop.f32.mrb[46].mxu1 }
0x1452   :  { %v1629_v21 = vadd.f32 %v3259_v20, %v1628_v19  ;;  %v2598_v22 = vpop.f32.mrb[47].mxu1  ;;  %v1632_v23 = vsel %vm221_vm3, %v1626_v17, -inf }
0x1453   :  { %1633 = vmax.xlane.f32.xlu1 %v1632_v23 }
0x1454   :  { %v1635_v24 = vsel %vm221_vm3, %v1629_v21, -inf }
0x1455   :  { %1636 = vmax.xlane.f32.xlu0 %v1635_v24 }
0x14e0   :  { %v1634_v25 = vpop.xlane.xlu1 %1633 }
0x14e1   :  { %v1638_v28 = vsub.f32 %v1626_v17, %v1634_v25 }
0x14e2   :  { %v1637_v29 = vpop.xlane.xlu0 %1636 }
0x14e3   :  { %v1640_v30 = vmul.f32 1.442695, %v1638_v28  ;;  %v1639_v31 = vsub.f32 %v1629_v21, %v1637_v29 }
0x14e5   :  { %2746 = vpow2.f32 %v1640_v30  ;;  %v1642_v32 = vmul.f32 1.442695, %v1639_v31 }
0x14e7   :  { %2748 = vpow2.f32 %v1642_v32 }
0x14ef   :  { %v2747_v34 = vpop.eup %2746 }
0x14f0   :  { %v1644_v0 = vsel %vm221_vm3, %v2747_v34, 0.0 }
0x14f1   :  { %v2749_v3 = vpop.eup %2748  ;;  %1645 = vadd.xlane.f32.xlu0 %v1644_v0 }
0x14f2   :  { %v1647_v36 = vsel %vm221_vm3, %v2749_v3, 0.0 }
0x14f3   :  { %1648 = vadd.xlane.f32.xlu1 %v1647_v36 }
0x1504   :  { %1760 = vrot.lane.b32.xlu1 %v3176_v39, %s3441_s24 }
0x1507   :  { %1661 = vrot.lane.b32.xlu0 %v3176_v39, %s3442_s7 }
0x1508   :  { %1758 = vrot.lane.b32.xlu1 %v3178_v40, %s3443_s4 }
0x157e   :  { %v1646_v37 = vpop.xlane.xlu0 %1645 }
0x157f   :  { %2750 = vrcp.f32 %v1646_v37 }
0x1580   :  { %v1649_v38 = vpop.xlane.xlu1 %1648 }
0x1581   :  { %2752 = vrcp.f32 %v1649_v38 }
0x1582   :  { %v1662_v41 = vpop.permute.xlu0 %1661 }
0x1583   :  { %2600 = vmatpush3.bf16.msra.mxu0 %v1662_v41 }
0x1584   :  { %2611 = vmatprep.subr.bf16.mxu0 %v2781_v4  ;;  %v1761_v53 = vpop.permute.xlu1 %1760 }
0x1585   :  { %v1766_v54 = vsel %vm173_vm2, %v1761_v53, 0 }
0x1588   :  { %v1759_v55 = vpop.permute.xlu1 %1758 }
0x1589   :  { %v2751_v42 = vpop.eup %2750 }
0x158a   :  { %v1652_v43 = vmul.f32 %v2751_v42, %v1646_v37 }
0x158b   :  { %v2753_v27 = vpop.eup %2752 }
0x158c   :  { %v1654_v44 = vsub.f32 2.0, %v1652_v43  ;;  %v1653_v45 = vmul.f32 %v2753_v27, %v1649_v38 }
0x158e   :  { %v1656_v46 = vmul.f32 %v2751_v42, %v1654_v44  ;;  %v1655_v48 = vsub.f32 2.0, %v1653_v45 }
0x1590   :  { %v1657_v50 = vmul.f32 %v2753_v27, %v1655_v48  ;;  %v1658_v51 = vmul.f32 %v2747_v34, %v1656_v46  ;;  %v2344_v48 = vld [vmem:[%s3400_s10 + $0x1] ss:$0 sm:$0xff] }
0x1592   :  { %v1659_v52 = vmul.f32 %v2749_v3, %v1657_v50 }
0x1594   :  { %v1660_v40 = vpack.c.bf16 %v1659_v52, %v1658_v51 }
0x1596   :  { %2602 = vmatmul.mubr.msk.bf16.vlgmr.msra.gmra.mrb[44].mxu0 %vm221_vm3, %v1660_v40 }
0x1597   :  { %2612 = vmatpush3.bf16.xpose.msra.mxu0 %v1766_v54  ;;  %2613 = vmatprep.mubr.msk.bf16.mxu0 %vm2782_vm0, %v2781_v4 }
0x1598   :  { %2623 = vmatprep.subr.bf16.mxu0 %v2781_v4 }
0x159e   :  { %2614 = vmatmul.mubr.msk.bf16.vlgmr.msra.gmra.mrb[48].mxu0 %vm173_vm2, %v1759_v55 }
0x159f   :  { %2625 = vmatprep.mubr.msk.bf16.mxu0 %vm2782_vm0, %v2781_v4 }
0x1669   :  { %v1701_v15 = vpop.f32.mrb[44].mxu0 }
0x166a   :  { %v2603_v59 = vpop.f32.mrb[45].mxu0 }
0x166b   :  { %v1704_v60 = vpop.f32.mrb[46].mxu0 }
0x166c   :  { %v1708_v61 = vpack.c.bf16 %v1704_v60, %v1701_v15  ;;  %v2604_v62 = vpop.f32.mrb[47].mxu0 }
0x166e   :  { %2608 = vmatmul.mubr.msk.bf16.vlgmr.msra.gmra.mrb[48].mxu1 %vm173_vm2, %v1708_v61 }
0x166f   :  { %2619 = vmatprep.mubr.msk.bf16.mxu1 %vm2782_vm0, %v2781_v4 }
0x1671   :  { %v1802_v63 = vpop.f32.mrb[48].mxu0 }
0x1672   :  { %v1803_v1 = vadd.f32 %v3253_v16, %v1802_v63  ;;  %v2615_v47 = vpop.f32.mrb[49].mxu0 }
0x1673   :  { %v1805_v2 = vpop.f32.mrb[50].mxu0 }
0x1674   :  { %v1806_v5 = vadd.f32 %v3259_v20, %v1805_v2  ;;  %v2616_v49 = vpop.f32.mrb[51].mxu0  ;;  %v1809_v33 = vsel %vm221_vm3, %v1803_v1, -inf }
0x1675   :  { %1810 = vmax.xlane.f32.xlu0 %v1809_v33  ;;  %v2680_v49 = vld [vmem:[%s3401_s13 + $0x10] sm:$0xff]   ;;  %v2681_v33 = vld [vmem:[%s3401_s13 + $0x18] sm:$0xff]  }
0x1676   :  { %v1812_v6 = vsel %vm221_vm3, %v1806_v5, -inf }
0x1677   :  { %1813 = vmax.xlane.f32.xlu1 %v1812_v6 }
0x1688   :  { %1838 = vrot.lane.b32.xlu1 %v3176_v39, %s3444_s29  ;;  %v2330_v39 = vld [vmem:[%s3399_s9 + $0x1c] sm:$0xf] }
0x1689   :  { %v1890_v20 = vsel %vm431_vm4, %v2330_v39, 0  ;;  %v2348_v39 = vld [vmem:[%s3403_s12 + $0x1] ss:$0 sm:$0xff] }
0x168a   :  { %2624 = vmatpush3.bf16.msra.mxu0 %v1890_v20 }
0x168b   :  { %2637 = vmatprep.subr.bf16.mxu0 %v2781_v4 }
0x1702   :  { %v1811_v7 = vpop.xlane.xlu0 %1810 }
0x1703   :  { %v1815_v8 = vsub.f32 %v1803_v1, %v1811_v7 }
0x1704   :  { %v1814_v35 = vpop.xlane.xlu1 %1813 }
0x1705   :  { %v1817_v10 = vmul.f32 1.442695, %v1815_v8  ;;  %v1816_v26 = vsub.f32 %v1806_v5, %v1814_v35 }
0x1707   :  { %2754 = vpow2.f32 %v1817_v10  ;;  %v1819_v12 = vmul.f32 1.442695, %v1816_v26 }
0x1708   :  { %v1839_v13 = vpop.permute.xlu1 %1838 }
0x1709   :  { %2756 = vpow2.f32 %v1819_v12  ;;  %2618 = vmatpush3.bf16.msra.mxu1 %v1839_v13 }
0x170a   :  { %2629 = vmatprep.subr.bf16.mxu1 %v2781_v4 }
0x1711   :  { %v2755_v16 = vpop.eup %2754 }
0x1712   :  { %v1821_v17 = vsel %vm221_vm3, %v2755_v16, 0.0 }
0x1713   :  { %v2757_v18 = vpop.eup %2756  ;;  %1822 = vadd.xlane.f32.xlu0 %v1821_v17 }
0x1714   :  { %v1824_v19 = vsel %vm221_vm3, %v2757_v18, 0.0 }
0x1717   :  { %1825 = vadd.xlane.f32.xlu0 %v1824_v19 }
0x1741   :  { %v1749_v21 = vpop.f32.mrb[48].mxu1 }
0x1742   :  { %v1756_v22 = vadd.f32 %v1749_v21, %v3246_v9  ;;  %v2609_v23 = vpop.f32.mrb[49].mxu1 }
0x1743   :  { %v1752_v24 = vpop.f32.mrb[50].mxu1 }
0x1744   :  { %v1757_v25 = vadd.f32 %v1752_v24, %v3248_v11  ;;  %v2610_v28 = vpop.f32.mrb[51].mxu1  ;;  %v2682_v24 = vld [vmem:[%s3404_s15 + $0x20] sm:$0xff]  }
0x1745   :  { %v2684_v28 = vld [vmem:[%s3404_s15 + $0x30] sm:$0xff]  }
0x17a0   :  { %v1823_v29 = vpop.xlane.xlu0 %1822 }
0x17a1   :  { %2758 = vrcp.f32 %v1823_v29 }
0x17a4   :  { %v1826_v30 = vpop.xlane.xlu0 %1825 }
0x17a5   :  { %2760 = vrcp.f32 %v1826_v30 }
0x17ab   :  { %v2759_v31 = vpop.eup %2758 }
0x17ac   :  { %v1829_v32 = vmul.f32 %v2759_v31, %v1823_v29  ;;  %v2685_v29 = vld [vmem:[%s3404_s15 + $0x38] sm:$0xff]  }
0x17ae   :  { %v1831_v34 = vsub.f32 2.0, %v1829_v32 }
0x17af   :  { %v2761_v0 = vpop.eup %2760 }
0x17b0   :  { %v1830_v3 = vmul.f32 %v2761_v0, %v1826_v30  ;;  %v1833_v36 = vmul.f32 %v2759_v31, %v1831_v34  ;;  %v2354_v30 = vld [vmem:[%s3405_s14 + $0x1] ss:$0 sm:$0xff] }
0x17b2   :  { %v1832_v37 = vsub.f32 2.0, %v1830_v3  ;;  %v1835_v41 = vmul.f32 %v2755_v16, %v1833_v36  ;;  %v2347_v16 = vld [vmem:[%s3402_s11 + $0x1] ss:$0 sm:$0xff] }
0x17b4   :  { %v1834_v38 = vmul.f32 %v2761_v0, %v1832_v37 }
0x17b6   :  { %v1836_v42 = vmul.f32 %v2757_v18, %v1834_v38 }
0x17b8   :  { %v1837_v9 = vpack.c.bf16 %v1836_v42, %v1835_v41 }
0x17ba   :  { %2620 = vmatmul.mubr.msk.bf16.vlgmr.msra.gmra.mrb[52].mxu1 %vm221_vm3, %v1837_v9 }
0x17bb   :  { %2633 = vmatprep.mubr.msk.bf16.mxu1 %vm2782_vm0, %v2781_v4  ;;  %2630 = vmatpush3.bf16.msra.mxu1 %v2680_v49 }
0x17bc   :  { %2631 = vmatprep.subr.bf16.mxu1 %v2781_v4 }
0x17bf   :  { %2632 = vmatpush3.bf16.msra.mxu1 %v2681_v33 }
0x17c0   :  { %2649 = vmatprep.subr.bf16.mxu1 %v2781_v4 }
0x188d   :  { %v1878_v11 = vpop.f32.mrb[52].mxu1 }
0x188e   :  { %v2621_v43 = vpop.f32.mrb[53].mxu1 }
0x188f   :  { %v1881_v27 = vpop.f32.mrb[54].mxu1 }
0x1890   :  { %v1885_v44 = vpack.c.bf16 %v1881_v27, %v1878_v11  ;;  %v2622_v45 = vpop.f32.mrb[55].mxu1 }
0x1892   :  { %2626 = vmatmul.mubr.msk.bf16.vlgmr.msra.gmra.mrb[52].mxu0 %vm173_vm2, %v1885_v44 }
0x1893   :  { %2645 = vmatprep.mubr.msk.bf16.mxu0 %vm2782_vm0, %v2781_v4  ;;  %2638 = vmatpush3.bf16.msra.mxu0 %v2682_v24 }
0x1894   :  { %2639 = vmatprep.subr.bf16.mxu0 %v2781_v4 }
0x1965   :  { %v1926_v46 = vpop.f32.mrb[52].mxu0 }
0x1966   :  { %v1933_v50 = vadd.f32 %v1926_v46, %v1756_v22  ;;  %v2627_v51 = vpop.f32.mrb[53].mxu0 }
0x1967   :  { %v1929_v52 = vpop.f32.mrb[54].mxu0 }
0x1968   :  { %v1943_v53 = vadd.f32 %v2344_v48, %v1933_v50  ;;  %v1934_v40 = vadd.f32 %v1929_v52, %v1757_v25  ;;  %v2628_v54 = vpop.f32.mrb[55].mxu0  ;;  %v2683_v25 = vld [vmem:[%s3404_s15 + $0x28] sm:$0xff]  }
0x1969   :  { %2640 = vmatpush3.bf16.msra.mxu0 %v2683_v25  ;;  %v2374_v25 = vld [vmem:[%s3411_s18] ss:$0 sm:$0xff] }
0x196a   :  { %v3315_v55 = vadd.f32 %v1943_v53, %v3143_v14  ;;  %v1944_v56 = vadd.f32 %v2344_v48, %v1934_v40  ;;  %2641 = vmatprep.subr.bf16.mxu0 %v2781_v4 }
0x196c   :  { %v3318_v57 = vadd.f32 %v1944_v56, %v3146_v58  ;;  %v1951_v15 = vsel %vm117_vm1, %v3315_v55, 0.0  ;;  %v2367_v56 = vld [vmem:[%s3406_s16 + $0x1] ss:$0 sm:$0xff] }
0x196d   :  { %1952 = vadd.xlane.f32.xlu0 %v1951_v15  ;;  %2642 = vmatpush3.bf16.msra.mxu0 %v2684_v28 }
0x196e   :  { %v1954_v59 = vsel %vm117_vm1, %v3318_v57, 0.0  ;;  %2643 = vmatprep.subr.bf16.mxu0 %v2781_v4 }
0x1971   :  { %1955 = vadd.xlane.f32.xlu0 %v1954_v59  ;;  %2644 = vmatpush3.bf16.msra.mxu0 %v2685_v29 }
0x19fa   :  { %v1953_v60 = vpop.xlane.xlu0 %1952 }
0x19fb   :  { %v1957_v61 = vmul.f32 0.03125, %v1953_v60 }
0x19fd   :  { %v1959_v62 = vsub.f32 %v3315_v55, %v1957_v61 }
0x19fe   :  { %v1956_v63 = vpop.xlane.xlu0 %1955 }
0x19ff   :  { %v1958_v1 = vmul.f32 0.03125, %v1956_v63  ;;  %v1961_v14 = vmul.f32 %v1959_v62, %v1959_v62 }
0x1a01   :  { %v1960_v47 = vsub.f32 %v3318_v57, %v1958_v1  ;;  %v1963_v58 = vsel %vm117_vm1, %v1961_v14, 0.0 }
0x1a02   :  { %1964 = vadd.xlane.f32.xlu0 %v1963_v58 }
0x1a03   :  { %v1962_v2 = vmul.f32 %v1960_v47, %v1960_v47 }
0x1a05   :  { %v1966_v5 = vsel %vm117_vm1, %v1962_v2, 0.0  ;;  %v26_v2 = vstv %s3409_s20 }
0x1a06   :  { %1967 = vadd.xlane.f32.xlu0 %v1966_v5  ;;  %27 = vst [vmem:[#allocation2] sm:$0x1] %v26_v2 }
0x1a8f   :  { %v1965_v6 = vpop.xlane.xlu0 %1964 }
0x1a90   :  { %v1969_v7 = vmul.f32 0.03125, %v1965_v6 }
0x1a92   :  { %v1971_v8 = vadd.f32 1e-06, %v1969_v7 }
0x1a93   :  { %v1968_v35 = vpop.xlane.xlu0 %1967 }
0x1a94   :  { %2762 = vrsqrt.f32 %v1971_v8  ;;  %v1970_v10 = vmul.f32 0.03125, %v1968_v35 }
0x1a96   :  { %v1972_v26 = vadd.f32 1e-06, %v1970_v10 }
0x1a98   :  { %2764 = vrsqrt.f32 %v1972_v26  ;;  %v2215_v26 = vld [vmem:[#allocation2] sm:$0x1] }
0x1a9e   :  { %v2763_v12 = vpop.eup %2762 }
0x1a9f   :  { %v1975_v13 = vmul.f32 %v2763_v12, %v1959_v62 }
0x1aa1   :  { %v1983_v18 = vmul.f32 %v2347_v16, %v1975_v13 }
0x1aa2   :  { %v2765_v17 = vpop.eup %2764 }
0x1aa3   :  { %v1976_v19 = vmul.f32 %v2765_v17, %v1960_v47  ;;  %v1991_v21 = vadd.f32 %v2348_v39, %v1983_v18 }
0x1aa5   :  { %v1984_v20 = vmul.f32 %v2347_v16, %v1976_v19 }
0x1aa7   :  { %v1992_v22 = vadd.f32 %v2348_v39, %v1984_v20 }
0x1aa9   :  { %v1993_v23 = vpack.c.bf16 %v1992_v22, %v1991_v21  ;;  %v2373_v21 = vld [vmem:[%s3410_s17] ss:$0 sm:$0xff] }
0x1aab   :  { %2634 = vmatmul.mubr.msk.bf16.vlgmr.msra.gmra.mrb[56].mxu1 %vm117_vm1, %v1993_v23 }
0x1aac   :  { %2651 = vmatprep.mubr.msk.bf16.mxu1 %vm2782_vm0, %v2781_v4 }
0x1b7e   :  { %v2056_v31 = vpop.f32.mrb[56].mxu1 }
0x1b7f   :  { %v2057_v32 = vadd.f32 %v2354_v30, %v2056_v31  ;;  %v2635_v34 = vpop.f32.mrb[57].mxu1 }
0x1b80   :  { %v2059_v0 = vpop.f32.mrb[58].mxu1  ;;  %v2213_v34 = vld [vmem:[%s3412_s19] sm:$0x1] }
0x1b81   :  { %v2065_v3 = vmul.f32 %v2057_v32, %v2057_v32  ;;  %v2060_v36 = vadd.f32 %v2354_v30, %v2059_v0  ;;  %v2636_v37 = vpop.f32.mrb[59].mxu1  ;;  %v2063_v50 = vmul.f32 0.5, %v2057_v32  ;;  %v2221_v0 = vlaneseq }
0x1b83   :  { %v2067_v38 = vmul.f32 %v2065_v3, %v2057_v32  ;;  %v2066_v41 = vmul.f32 %v2060_v36, %v2060_v36  ;;  %v2064_v51 = vmul.f32 0.5, %v2060_v36  ;;  %v2222_v3 = vshrl.u32 %v2221_v0, 7 }
0x1b85   :  { %v2069_v42 = vmul.f32 0.044715, %v2067_v38  ;;  %v2068_v4 = vmul.f32 %v2066_v41, %v2060_v36 }
0x1b87   :  { %v2071_v9 = vadd.f32 %v2069_v42, %v2057_v32  ;;  %v2070_v11 = vmul.f32 0.044715, %v2068_v4 }
0x1b89   :  { %v2073_v43 = vmul.f32 0.7978846, %v2071_v9  ;;  %v2072_v27 = vadd.f32 %v2070_v11, %v2060_v36  ;;  %v2223_v36 = vsub.s32 0, %v2222_v3 }
0x1b8b   :  { %2766 = vtanh.f32 %v2073_v43  ;;  %v2074_v44 = vmul.f32 0.7978846, %v2072_v27 }
0x1b8d   :  { %2768 = vtanh.f32 %v2074_v44 }
0x1b95   :  { %v2767_v45 = vpop.eup %2766 }
0x1b96   :  { %v2077_v46 = vadd.f32 1.0, %v2767_v45  ;;  %v2277_v45 = vld [vmem:[%s3413_s2] sm:$0x1] }
0x1b97   :  { %v2769_v48 = vpop.eup %2768 }
0x1b98   :  { %v2078_v52 = vadd.f32 1.0, %v2769_v48  ;;  %v2079_v53 = vmul.f32 %v2077_v46, %v2063_v50 }
0x1b9a   :  { %v2080_v40 = vmul.f32 %v2078_v52, %v2064_v51 }
0x1b9c   :  { %v2081_v54 = vpack.c.bf16 %v2080_v40, %v2079_v53 }
0x1b9e   :  { %2646 = vmatmul.mubr.msk.bf16.vlgmr.msra.gmra.mrb[56].mxu0 %vm1059_vm5, %v2081_v54 }
0x1c71   :  { %v2160_v15 = vpop.f32.mrb[56].mxu0 }
0x1c72   :  { %v2161_v59 = vadd.f32 %v2367_v56, %v2160_v15  ;;  %v2647_v60 = vpop.f32.mrb[57].mxu0 }
0x1c73   :  { %v2163_v61 = vpop.f32.mrb[58].mxu0 }
0x1c74   :  { %v2164_v62 = vadd.f32 %v2367_v56, %v2163_v61  ;;  %v2648_v63 = vpop.f32.mrb[59].mxu0  ;;  %v2167_v1 = vadd.f32 %v2161_v59, %v3315_v55 }
0x1c76   :  { %v2171_v14 = vsel %vm117_vm1, %v2167_v1, 0.0  ;;  %v2168_v47 = vadd.f32 %v2164_v62, %v3318_v57 }
0x1c77   :  { %2172 = vadd.xlane.f32.xlu1 %v2171_v14 }
0x1c78   :  { %v2174_v58 = vsel %vm117_vm1, %v2168_v47, 0.0 }
0x1c79   :  { %2175 = vadd.xlane.f32.xlu0 %v2174_v58 }
0x1d04   :  { %v2173_v5 = vpop.xlane.xlu1 %2172 }
0x1d05   :  { %v2177_v49 = vmul.f32 0.03125, %v2173_v5 }
0x1d06   :  { %v2176_v33 = vpop.xlane.xlu0 %2175 }
0x1d07   :  { %v2179_v6 = vsub.f32 %v2167_v1, %v2177_v49  ;;  %v2178_v7 = vmul.f32 0.03125, %v2176_v33 }
0x1d09   :  { %v2180_v8 = vsub.f32 %v2168_v47, %v2178_v7  ;;  %v2181_v55 = vmul.f32 %v2179_v6, %v2179_v6 }
0x1d0b   :  { %v2183_v35 = vsel %vm117_vm1, %v2181_v55, 0.0  ;;  %v2182_v10 = vmul.f32 %v2180_v8, %v2180_v8 }
0x1d0c   :  { %2184 = vadd.xlane.f32.xlu0 %v2183_v35 }
0x1d0d   :  { %v2186_v57 = vsel %vm117_vm1, %v2182_v10, 0.0 }
0x1d10   :  { %2187 = vadd.xlane.f32.xlu0 %v2186_v57 }
0x1d26   :  { %2218 = vperm.xlu0 %2669, %v2215_v26  }
0x1d99   :  { %v2185_v12 = vpop.xlane.xlu0 %2184 }
0x1d9a   :  { %v2189_v13 = vmul.f32 0.03125, %v2185_v12 }
0x1d9c   :  { %v2191_v16 = vadd.f32 1e-06, %v2189_v13 }
0x1d9d   :  { %v2188_v17 = vpop.xlane.xlu0 %2187 }
0x1d9e   :  { %2770 = vrsqrt.f32 %v2191_v16  ;;  %v2190_v18 = vmul.f32 0.03125, %v2188_v17 }
0x1da0   :  { %v2192_v19 = vadd.f32 1e-06, %v2190_v18 }
0x1da2   :  { %2772 = vrsqrt.f32 %v2192_v19 }
0x1da5   :  { %v2219_v37 = vpop.permute.xlu0 %2218 }
0x1da6   :  { %v2224_v38 = vrot.slane %v2219_v37, %v2223_v36 }
0x1da8   :  { %v2771_v39 = vpop.eup %2770 }
0x1da9   :  { %v2195_v20 = vmul.f32 %v2771_v39, %v2179_v6 }
0x1dab   :  { %v2203_v24 = vmul.f32 %v2373_v21, %v2195_v20 }
0x1dac   :  { %v2773_v22 = vpop.eup %2772 }
0x1dad   :  { %v2196_v23 = vmul.f32 %v2773_v22, %v2180_v8  ;;  %v2211_v29 = vadd.f32 %v2374_v25, %v2203_v24 }
0x1daf   :  { %v2204_v28 = vmul.f32 %v2373_v21, %v2196_v23 }
0x1db1   :  { %v2212_v30 = vadd.f32 %v2374_v25, %v2204_v28 }
0x1db3   :  { %v2214_v31 = vpack.c.bf16 %v2212_v30, %v2211_v29 }
0x1db5   :  { %v2229_v32 = vsel %vm117_vm1, %v2214_v31, 0 }
0x1db6   :  { %2650 = vmatpush3.bf16.xpose.msra.mxu1 %v2229_v32 }
0x1dbd   :  { %2652 = vmatmul.mubr.msk.bf16.vlgmr.msra.gmra.mrb[60].mxu1 %vm117_vm1, %v2213_v34 }
0x1e90   :  { %v2265_v41 = vpop.f32.mrb[60].mxu1 }
0x1e91   :  { %v2266_v42 = vadd.f32 %v2265_v41, %v2224_v38  ;;  %v2653_v4 = vpop.f32.mrb[61].mxu1 }
0x1e92   :  { %v2268_v9 = vpop.f32.mrb[62].mxu1 }
0x1e93   :  { %v2376_v11 = vmul.f32 -1.442695, %v2266_v42  ;;  %v2654_v43 = vpop.f32.mrb[63].mxu1 }
0x1e95   :  { %2774 = vpow2.f32 %v2376_v11 }
0x1e9f   :  { %v2775_v27 = vpop.eup %2774 }
0x1ea0   :  { %v2274_v44 = vadd.f32 1.0, %v2775_v27 }
0x1ea2   :  { %2776 = vrcp.f32 %v2274_v44 }
0x1eac   :  { %v2777_v46 = vpop.eup %2776 }
0x1ead   :  { %v2278_v48 = vmul.f32 %v2777_v46, %v2277_v45 }
0x1eaf   :  { %2280 = vst.msk [vmem:[%s3414_s21] sm:$0x1] %vm2279_vm6, %v2278_v48 }

</bundles_post_ra>
